<compile_context>
chip_gen: v7x
topology: tpu7x:2x2x1
jax: 0.10.0
libtpu: 0.0.40
codegen_flags: <defaults>
</compile_context>

<pallas_src>
import functools

import jax
import jax.numpy as jnp
from jax import lax
from jax.experimental import pallas as pl
from jax.experimental.pallas import tpu as pltpu


EPS = 1e-5


def _generator_kernel(x_ref, w1_ref, w2_ref, bn_ref, w3_ref, b3_ref,
                      out_ref, h_ref):
    """Grid: (out_dim // TN,) column tiles of layer 3.

    x_ref  : (B, latent)   f32   resident
    w1_ref : (latent, H)   bf16  resident
    w2_ref : (H, H)        bf16  resident
    bn_ref : (8, H)        f32   rows = [g1, beta1, g2, beta2, pad x4]
    w3_ref : (H, TN)       bf16  column tile (double-buffered)
    b3_ref : (1, TN)       f32   column tile
    out_ref: (B, TN)       out_dtype
    h_ref  : (B, H)        bf16  VMEM scratch (layer-2 activations)
    """
    j = pl.program_id(0)

    @pl.when(j == 0)
    def _():
        # Layers 1-2 computed once, reused by all column tiles.
        B = x_ref.shape[0]
        inv_b = 1.0 / B

        def bn_relu_bf16(h, g, beta):
            # Two independent XLU reductions in one sweep; var = E[h^2]-mu^2
            # (biased batch variance, clamped at 0 against cancellation).
            s = jnp.sum(h, axis=0, keepdims=True)
            ss = jnp.sum(h * h, axis=0, keepdims=True)
            mu = s * inv_b
            var = jnp.maximum(ss * inv_b - mu * mu, 0.0)
            scale = g * lax.rsqrt(var + EPS)          # rsqrt -> EUP slot
            shift = beta - mu * scale
            # One FMA-ish pass + ReLU, downcast fused into the epilogue.
            return jnp.maximum(h * scale + shift, 0.0).astype(jnp.bfloat16)

        # ---- Layer 1: Linear (bias cancelled by BN) -> BN -> ReLU ----
        x = x_ref[...].astype(jnp.bfloat16)
        h = jnp.dot(x, w1_ref[...], preferred_element_type=jnp.float32)
        h = bn_relu_bf16(h, bn_ref[0:1, :], bn_ref[1:2, :])

        # ---- Layer 2: Linear (bias cancelled by BN) -> BN -> ReLU ----
        h = jnp.dot(h, w2_ref[...], preferred_element_type=jnp.float32)
        h_ref[...] = bn_relu_bf16(h, bn_ref[2:3, :], bn_ref[3:4, :])

    # ---- Layer 3 (per column tile): Linear output projection ----
    out_ref[...] = (jnp.dot(h_ref[...], w3_ref[...],
                            preferred_element_type=jnp.float32)
                    + b3_ref[...]).astype(out_ref.dtype)


def generator_forward(noise, params, input_shape, *, out_dtype=jnp.float32):
    """noise: (B, latent_dim) f32.  Returns (B, *input_shape) in out_dtype."""
    B, latent = noise.shape
    H = params["w1"].shape[1]
    out_dim = params["w3"].shape[1]

    # Column tile for layer 3 / output (lane-dense, multiple of 128 when
    # possible; falls back to the full width for odd out_dim).
    tn = out_dim
    for cand in (512, 256, 128):
        if out_dim % cand == 0:
            tn = cand
            break
    grid = (out_dim // tn,)

    flops = 2 * B * (latent * H + H * H + H * out_dim)
    bytes_accessed = (
        noise.size * 4
        + (params["w1"].size + params["w2"].size + params["w3"].size) * 2  # bf16
        + (params["bn_vec"].size + params["b3"].size) * 4
        + B * out_dim * jnp.dtype(out_dtype).itemsize
    )

    grid_spec = pltpu.PrefetchScalarGridSpec(
        num_scalar_prefetch=0,
        grid=grid,
        in_specs=[
            pl.BlockSpec((B, latent), lambda j: (0, 0)),   # x       (resident)
            pl.BlockSpec((latent, H), lambda j: (0, 0)),   # w1      (resident)
            pl.BlockSpec((H, H),      lambda j: (0, 0)),   # w2      (resident)
            pl.BlockSpec((8, H),      lambda j: (0, 0)),   # bn_vec  (resident)
            pl.BlockSpec((H, tn),     lambda j: (0, j)),   # w3      (col tile)
            pl.BlockSpec((1, tn),     lambda j: (0, j)),   # b3      (col tile)
        ],
        out_specs=pl.BlockSpec((B, tn), lambda j: (0, j)),
        scratch_shapes=[pltpu.VMEM((B, H), jnp.bfloat16)],
    )

    flat = pl.pallas_call(
        _generator_kernel,
        out_shape=jax.ShapeDtypeStruct((B, out_dim), out_dtype),
        grid_spec=grid_spec,
        compiler_params=pltpu.CompilerParams(
            dimension_semantics=("arbitrary",)),
        cost_estimate=pl.CostEstimate(
            flops=flops, transcendentals=2 * H, bytes_accessed=bytes_accessed),
    )(noise, params["w1"], params["w2"], params["bn_vec"],
      params["w3"], params["b3"])

    # Glue: PyTorch's .view(B, *input_shape) — pure reshape.
    return flat.reshape((B,) + tuple(input_shape))


def _reference_forward(noise, params, mixed):
    """Pure-JAX reference.  Keeps the layer-1/2 Linear biases to demonstrate
    that dropping them before train-mode BN (as the kernel does) is exact.
    `mixed=True` mirrors the kernel's bf16-matmul-input policy (tight check);
    `mixed=False` is an all-f32-activation reference (loose check)."""
    w1 = params["w1"].astype(jnp.float32)
    w2 = params["w2"].astype(jnp.float32)
    w3 = params["w3"].astype(jnp.float32)
    bn = params["bn_vec"]
    g1, beta1, g2, beta2 = bn[0:1], bn[1:2], bn[2:3], bn[3:4]
    b1, b2 = params["b1"], params["b2"]

    def mm(x, w):
        if mixed:
            x = x.astype(jnp.bfloat16).astype(jnp.float32)
        return jnp.dot(x, w, preferred_element_type=jnp.float32)

    def bn_apply(h, g, b):
        mu = jnp.mean(h, axis=0, keepdims=True)
        var = jnp.mean((h - mu) ** 2, axis=0, keepdims=True)  # biased, two-pass
        return g * (h - mu) / jnp.sqrt(var + EPS) + b

    x = noise.astype(jnp.bfloat16).astype(jnp.float32) if mixed else noise
    h = mm(x, w1) + b1
    h = jnp.maximum(bn_apply(h, g1, beta1), 0.0)
    h = mm(h, w2) + b2
    h = jnp.maximum(bn_apply(h, g2, beta2), 0.0)
    return mm(h, w3) + params["b3"]


def init_params(key, latent_dim, hidden, out_dim):
    """Deterministic synthetic parameters.  Weights stored as (in, out) bf16
    so the kernel computes x @ W (== PyTorch x @ W.T with W=(out,in)).
    b1/b2 are kept only for the reference (they cancel under train-mode BN);
    the kernel consumes the (8, hidden) packed [g1, beta1, g2, beta2, pad]."""
    ks = jax.random.split(key, 6)
    s1 = 1.0 / jnp.sqrt(latent_dim)
    s2 = 1.0 / jnp.sqrt(hidden)
    w1 = jax.random.uniform(ks[0], (latent_dim, hidden), jnp.float32, -s1, s1)
    b1 = jax.random.uniform(ks[1], (hidden,), jnp.float32, -s1, s1)
    w2 = jax.random.uniform(ks[2], (hidden, hidden), jnp.float32, -s2, s2)
    b2 = jax.random.uniform(ks[3], (hidden,), jnp.float32, -s2, s2)
    w3 = jax.random.uniform(ks[4], (hidden, out_dim), jnp.float32, -s2, s2)
    b3 = jax.random.uniform(ks[5], (out_dim,), jnp.float32, -s2, s2)
    g1 = jnp.ones((hidden,), jnp.float32)
    g2 = jnp.ones((hidden,), jnp.float32)
    z = jnp.zeros((hidden,), jnp.float32)
    bn_vec = jnp.stack([g1, z, g2, z, z, z, z, z], axis=0)    # (8, H) f32
    return {
        "w1": w1.astype(jnp.bfloat16),
        "w2": w2.astype(jnp.bfloat16),
        "w3": w3.astype(jnp.bfloat16),
        "bn_vec": bn_vec,
        "b3": b3.reshape(1, out_dim),
        # Reference-only (cancelled by train-mode BatchNorm in the kernel):
        "b1": b1.reshape(1, hidden),
        "b2": b2.reshape(1, hidden),
    }


if __name__ == "__main__":
    # Small shapes consistent with the module: opt.latent_dim=32, image (4,16,16).
    B = 8
    LATENT_DIM = 32
    HIDDEN = 512                     # fixed by the module definition
    INPUT_SHAPE = (4, 16, 16)        # prod = 1024
    OUT_DIM = 4 * 16 * 16

    key = jax.random.PRNGKey(0)
    k_noise, k_params = jax.random.split(key)

    noise = jax.random.normal(k_noise, (B, LATENT_DIM), jnp.float32)
    params = init_params(k_params, LATENT_DIM, HIDDEN, OUT_DIM)

    fwd = jax.jit(functools.partial(generator_forward, input_shape=INPUT_SHAPE))
    out = fwd(noise, params)
    jax.block_until_ready(out)

    assert out.shape == (B,) + INPUT_SHAPE, out.shape

    # Tight check vs. a reference that mirrors the kernel's mixed precision
    # (reference keeps the pre-BN biases; kernel drops them — must still match).
    ref_mixed = _reference_forward(noise, params, mixed=True).reshape(out.shape)
    assert jnp.allclose(out, ref_mixed, atol=1e-2, rtol=1e-2), \
        "mismatch vs mixed-precision reference"

    # Loose check vs. an all-f32-activation reference (bf16 weights) — bounds
    # total drift introduced by casting activations to bf16 for the matmuls.
    ref_f32 = _reference_forward(noise, params, mixed=False).reshape(out.shape)
    assert jnp.allclose(out, ref_f32, atol=6e-2, rtol=6e-2), \
        "mismatch vs f32 reference"

    print("KERNEL_OK")
</pallas_src>

<mosaic_0001>
module attributes {stable_mosaic.version = 11 : i64} {
  func.func @_generator_kernel(%arg0: i32, %arg1: memref<8x32xf32, #tpu.memory_space<vmem>>, %arg2: memref<32x512xbf16, #tpu.memory_space<vmem>>, %arg3: memref<512x512xbf16, #tpu.memory_space<vmem>>, %arg4: memref<8x512xf32, #tpu.memory_space<vmem>>, %arg5: memref<512x512xbf16, #tpu.memory_space<vmem>>, %arg6: memref<1x512xf32, #tpu.memory_space<vmem>>, %arg7: memref<8x512xf32, #tpu.memory_space<vmem>>, %arg8: memref<8x512xbf16, #tpu.memory_space<vmem>>) attributes {dimension_semantics = [#tpu.dimension_semantics<arbitrary>], iteration_bounds = array<i64: 2>, scalar_prefetch = 0 : i64, scratch_operands = 1 : i64, tpu.core_type = #tpu.core_type<tc>, window_params = [{pipeline_mode = #tpu.pipeline_mode<synchronous>, transform_indices = @transform_0, window_bounds = array<i64: 8, 32>}, {pipeline_mode = #tpu.pipeline_mode<synchronous>, transform_indices = @transform_1, window_bounds = array<i64: 32, 512>}, {pipeline_mode = #tpu.pipeline_mode<synchronous>, transform_indices = @transform_2, window_bounds = array<i64: 512, 512>}, {pipeline_mode = #tpu.pipeline_mode<synchronous>, transform_indices = @transform_3, window_bounds = array<i64: 8, 512>}, {transform_indices = @transform_4, window_bounds = array<i64: 512, 512>}, {transform_indices = @transform_5, window_bounds = array<i64: 1, 512>}, {transform_indices = @transform_6, window_bounds = array<i64: 8, 512>}]} {
    %c0_i32 = arith.constant 0 : i32
    %0 = arith.cmpi eq, %arg0, %c0_i32 : i32
    %1 = arith.extui %0 : i1 to i32
    %c0_i32_0 = arith.constant 0 : i32
    %2 = arith.cmpi ne, %1, %c0_i32_0 : i32
    scf.if %2 {
      %c0_8 = arith.constant 0 : index
      %c0_9 = arith.constant 0 : index
      %10 = vector.load %arg1[%c0_8, %c0_9] : memref<8x32xf32, #tpu.memory_space<vmem>>, vector<8x32xf32>
      %11 = arith.truncf %10 : vector<8x32xf32> to vector<8x32xbf16>
      %c0_10 = arith.constant 0 : index
      %c0_11 = arith.constant 0 : index
      %12 = vector.load %arg2[%c0_10, %c0_11] : memref<32x512xbf16, #tpu.memory_space<vmem>>, vector<32x512xbf16>
      %cst_12 = arith.constant dense<0.000000e+00> : vector<8x512xf32>
      %13 = tpu.matmul %11, %12, %cst_12 {dimension_numbers = #tpu.dot_dimension_numbers<[1], [0], [0], [1], [0, 0, 1, 1], [], []>} : vector<8x32xbf16>, vector<32x512xbf16>, vector<8x512xf32> -> vector<8x512xf32>
      %c0_13 = arith.constant 0 : index
      %c0_14 = arith.constant 0 : index
      %14 = vector.load %arg4[%c0_13, %c0_14] : memref<8x512xf32, #tpu.memory_space<vmem>>, vector<1x512xf32>
      %c1 = arith.constant 1 : index
      %c0_15 = arith.constant 0 : index
      %15 = vector.load %arg4[%c1, %c0_15] : memref<8x512xf32, #tpu.memory_space<vmem>>, vector<1x512xf32>
      %cst_16 = arith.constant dense<0.000000e+00> : vector<512xf32>
      %16 = vector.multi_reduction <add>, %13, %cst_16 [0] : vector<8x512xf32> to vector<512xf32>
      %17 = vector.shape_cast %16 : vector<512xf32> to vector<1x512xf32>
      %18 = arith.mulf %13, %13 : vector<8x512xf32>
      %cst_17 = arith.constant dense<0.000000e+00> : vector<512xf32>
      %19 = vector.multi_reduction <add>, %18, %cst_17 [0] : vector<8x512xf32> to vector<512xf32>
      %20 = vector.shape_cast %19 : vector<512xf32> to vector<1x512xf32>
      %cst_18 = arith.constant 1.250000e-01 : f32
      %21 = vector.broadcast %cst_18 : f32 to vector<1x512xf32>
      %22 = arith.mulf %17, %21 : vector<1x512xf32>
      %cst_19 = arith.constant 1.250000e-01 : f32
      %23 = vector.broadcast %cst_19 : f32 to vector<1x512xf32>
      %24 = arith.mulf %20, %23 : vector<1x512xf32>
      %25 = arith.mulf %22, %22 : vector<1x512xf32>
      %26 = arith.subf %24, %25 : vector<1x512xf32>
      %cst_20 = arith.constant 0.000000e+00 : f32
      %27 = vector.broadcast %cst_20 : f32 to vector<1x512xf32>
      %28 = arith.maximumf %26, %27 : vector<1x512xf32>
      %cst_21 = arith.constant 9.99999974E-6 : f32
      %29 = vector.broadcast %cst_21 : f32 to vector<1x512xf32>
      %30 = arith.addf %28, %29 : vector<1x512xf32>
      %31 = math.rsqrt %30 : vector<1x512xf32>
      %32 = arith.mulf %14, %31 : vector<1x512xf32>
      %33 = arith.mulf %22, %32 : vector<1x512xf32>
      %34 = arith.subf %15, %33 : vector<1x512xf32>
      %35 = vector.broadcast %32 : vector<1x512xf32> to vector<8x512xf32>
      %36 = arith.mulf %13, %35 : vector<8x512xf32>
      %37 = vector.broadcast %34 : vector<1x512xf32> to vector<8x512xf32>
      %38 = arith.addf %36, %37 : vector<8x512xf32>
      %cst_22 = arith.constant 0.000000e+00 : f32
      %39 = vector.broadcast %cst_22 : f32 to vector<8x512xf32>
      %40 = arith.maximumf %38, %39 : vector<8x512xf32>
      %41 = arith.truncf %40 : vector<8x512xf32> to vector<8x512xbf16>
      %c0_23 = arith.constant 0 : index
      %c0_24 = arith.constant 0 : index
      %42 = vector.load %arg3[%c0_23, %c0_24] : memref<512x512xbf16, #tpu.memory_space<vmem>>, vector<512x512xbf16>
      %cst_25 = arith.constant dense<0.000000e+00> : vector<8x512xf32>
      %43 = tpu.matmul %41, %42, %cst_25 {dimension_numbers = #tpu.dot_dimension_numbers<[1], [0], [0], [1], [0, 0, 1, 1], [], []>} : vector<8x512xbf16>, vector<512x512xbf16>, vector<8x512xf32> -> vector<8x512xf32>
      %c2 = arith.constant 2 : index
      %c0_26 = arith.constant 0 : index
      %44 = vector.load %arg4[%c2, %c0_26] : memref<8x512xf32, #tpu.memory_space<vmem>>, vector<1x512xf32>
      %c3 = arith.constant 3 : index
      %c0_27 = arith.constant 0 : index
      %45 = vector.load %arg4[%c3, %c0_27] : memref<8x512xf32, #tpu.memory_space<vmem>>, vector<1x512xf32>
      %cst_28 = arith.constant dense<0.000000e+00> : vector<512xf32>
      %46 = vector.multi_reduction <add>, %43, %cst_28 [0] : vector<8x512xf32> to vector<512xf32>
      %47 = vector.shape_cast %46 : vector<512xf32> to vector<1x512xf32>
      %48 = arith.mulf %43, %43 : vector<8x512xf32>
      %cst_29 = arith.constant dense<0.000000e+00> : vector<512xf32>
      %49 = vector.multi_reduction <add>, %48, %cst_29 [0] : vector<8x512xf32> to vector<512xf32>
      %50 = vector.shape_cast %49 : vector<512xf32> to vector<1x512xf32>
      %cst_30 = arith.constant 1.250000e-01 : f32
      %51 = vector.broadcast %cst_30 : f32 to vector<1x512xf32>
      %52 = arith.mulf %47, %51 : vector<1x512xf32>
      %cst_31 = arith.constant 1.250000e-01 : f32
      %53 = vector.broadcast %cst_31 : f32 to vector<1x512xf32>
      %54 = arith.mulf %50, %53 : vector<1x512xf32>
      %55 = arith.mulf %52, %52 : vector<1x512xf32>
      %56 = arith.subf %54, %55 : vector<1x512xf32>
      %cst_32 = arith.constant 0.000000e+00 : f32
      %57 = vector.broadcast %cst_32 : f32 to vector<1x512xf32>
      %58 = arith.maximumf %56, %57 : vector<1x512xf32>
      %cst_33 = arith.constant 9.99999974E-6 : f32
      %59 = vector.broadcast %cst_33 : f32 to vector<1x512xf32>
      %60 = arith.addf %58, %59 : vector<1x512xf32>
      %61 = math.rsqrt %60 : vector<1x512xf32>
      %62 = arith.mulf %44, %61 : vector<1x512xf32>
      %63 = arith.mulf %52, %62 : vector<1x512xf32>
      %64 = arith.subf %45, %63 : vector<1x512xf32>
      %65 = vector.broadcast %62 : vector<1x512xf32> to vector<8x512xf32>
      %66 = arith.mulf %43, %65 : vector<8x512xf32>
      %67 = vector.broadcast %64 : vector<1x512xf32> to vector<8x512xf32>
      %68 = arith.addf %66, %67 : vector<8x512xf32>
      %cst_34 = arith.constant 0.000000e+00 : f32
      %69 = vector.broadcast %cst_34 : f32 to vector<8x512xf32>
      %70 = arith.maximumf %68, %69 : vector<8x512xf32>
      %71 = arith.truncf %70 : vector<8x512xf32> to vector<8x512xbf16>
      %c0_35 = arith.constant 0 : index
      %c0_36 = arith.constant 0 : index
      %72 = vector.load %arg8[%c0_35, %c0_36] : memref<8x512xbf16, #tpu.memory_space<vmem>>, vector<8x512xbf16>
      tpu.vector_store %arg8[%c0_35, %c0_36], %71 {strides = array<i32>} : memref<8x512xbf16, #tpu.memory_space<vmem>>, vector<8x512xbf16>,
    } else {
    }
    %c0 = arith.constant 0 : index
    %c0_1 = arith.constant 0 : index
    %3 = vector.load %arg8[%c0, %c0_1] : memref<8x512xbf16, #tpu.memory_space<vmem>>, vector<8x512xbf16>
    %c0_2 = arith.constant 0 : index
    %c0_3 = arith.constant 0 : index
    %4 = vector.load %arg5[%c0_2, %c0_3] : memref<512x512xbf16, #tpu.memory_space<vmem>>, vector<512x512xbf16>
    %cst = arith.constant dense<0.000000e+00> : vector<8x512xf32>
    %5 = tpu.matmul %3, %4, %cst {dimension_numbers = #tpu.dot_dimension_numbers<[1], [0], [0], [1], [0, 0, 1, 1], [], []>} : vector<8x512xbf16>, vector<512x512xbf16>, vector<8x512xf32> -> vector<8x512xf32>
    %c0_4 = arith.constant 0 : index
    %c0_5 = arith.constant 0 : index
    %6 = vector.load %arg6[%c0_4, %c0_5] : memref<1x512xf32, #tpu.memory_space<vmem>>, vector<1x512xf32>
    %7 = vector.broadcast %6 : vector<1x512xf32> to vector<8x512xf32>
    %8 = arith.addf %5, %7 : vector<8x512xf32>
    %c0_6 = arith.constant 0 : index
    %c0_7 = arith.constant 0 : index
    %9 = vector.load %arg7[%c0_6, %c0_7] : memref<8x512xf32, #tpu.memory_space<vmem>>, vector<8x512xf32>
    tpu.vector_store %arg7[%c0_6, %c0_7], %8 {strides = array<i32>} : memref<8x512xf32, #tpu.memory_space<vmem>>, vector<8x512xf32>,
    return
  }
  func.func @transform_0(%arg0: i32) -> (i32, i32) {
    %c0_i32 = arith.constant 0 : i32
    %c0_i32_0 = arith.constant 0 : i32
    %c0_i32_1 = arith.constant 0 : i32
    return %c0_i32, %c0_i32_0 : i32, i32
  }
  func.func @transform_1(%arg0: i32) -> (i32, i32) {
    %c0_i32 = arith.constant 0 : i32
    %c0_i32_0 = arith.constant 0 : i32
    %c0_i32_1 = arith.constant 0 : i32
    return %c0_i32, %c0_i32_0 : i32, i32
  }
  func.func @transform_2(%arg0: i32) -> (i32, i32) {
    %c0_i32 = arith.constant 0 : i32
    %c0_i32_0 = arith.constant 0 : i32
    %c0_i32_1 = arith.constant 0 : i32
    return %c0_i32, %c0_i32_0 : i32, i32
  }
  func.func @transform_3(%arg0: i32) -> (i32, i32) {
    %c0_i32 = arith.constant 0 : i32
    %c0_i32_0 = arith.constant 0 : i32
    %c0_i32_1 = arith.constant 0 : i32
    return %c0_i32, %c0_i32_0 : i32, i32
  }
  func.func @transform_4(%arg0: i32) -> (i32, i32) {
    %c0_i32 = arith.constant 0 : i32
    %c0_i32_0 = arith.constant 0 : i32
    return %c0_i32, %arg0 : i32, i32
  }
  func.func @transform_5(%arg0: i32) -> (i32, i32) {
    %c0_i32 = arith.constant 0 : i32
    %c0_i32_0 = arith.constant 0 : i32
    return %c0_i32, %arg0 : i32, i32
  }
  func.func @transform_6(%arg0: i32) -> (i32, i32) {
    %c0_i32 = arith.constant 0 : i32
    %c0_i32_0 = arith.constant 0 : i32
    return %c0_i32, %arg0 : i32, i32
  }
}

</mosaic_0001>

<bundles_post_ra>
// kernel: generator_forward.1
= control target key start
LH: loop header
LB: loop body
LE: loop exit
PB: predicated region body
PF: predicated region fallthrough
CT: control target
= control target key end

     0   :  { %s4571_s0 = inlined_call_operand.hbm [shape: f32[8,32], index: 0, kind: input, shape index: {}]   ;;  %s4572_s1 = inlined_call_operand.hbm [shape: bf16[32,512], index: 1, kind: input, shape index: {}]   ;;  %s4573_s2 = inlined_call_operand.hbm [shape: bf16[512,512], index: 2, kind: input, shape index: {}]   ;;  %s4574_s3 = inlined_call_operand.hbm [shape: f32[8,512], index: 3, kind: input, shape index: {}]   ;;  %s4575_s4 = inlined_call_operand.hbm [shape: bf16[512,1024], index: 4, kind: input, shape index: {}]   ;;  %s4576_s5 = inlined_call_operand.hbm [shape: f32[1,1024], index: 5, kind: input, shape index: {}]   ;;  %s4577_s6 = inlined_call_operand.vmem [shape: f32[8,1024], index: 6, kind: output, shape index: {}]  }
   0x1   :  { %4586 = sst [smem:[#allocation16_spill]] %s4571_s0 }
   0x2   :  { %4587 = sst [smem:[#allocation17_spill]] %s4572_s1 }
   0x3   :  { %4588 = sst [smem:[#allocation18_spill]] %s4575_s4 }
   0x4   :  { %11 = vsyncpa [#allocation4], 0 }
   0x5   :  { %12 = vsyncpa [#allocation6], 0 }
   0x6   :  { %13 = vsyncpa [#allocation9], 0  ;;  %s4053_s21 = smov 0   ;;  %s4055_s22 = smov 0  }
   0x7   :  { %s4057_s23 = smov 0   ;;  %s4059_s24 = smov 0  }
   0x8 LB: > { %s4072_s25 = sadd.s32 4294967295, %s4005_s24   ;;  %s4075_s26 = sadd.s32 1, %s4005_s24   ;;  %s4005_s24 = sphi %s4059_s24, %s4615_s24   ;;  %s4001_s23 = sphi %s4057_s23, %s4614_s23   ;;  %s3997_s22 = sphi %s4055_s22, %s4613_s22   ;;  %s3993_s21 = sphi %s4053_s21, %s4612_s21  }
   0x9   : > { %s107_s27 = ssub.s32 %s4005_s24, %s4075_s26  ;;  %s110_s28 = sadd.s32 1, %s4001_s23 }
   0xa   : > { %p108_p0 = scmp.eq.s32.totalorder %s107_s27, 0  ;;  %p117_p1 = scmp.ne.s32.totalorder %s4001_s23, %s3997_s22 }
   0xb   : > { %p118_p2 = scmp.eq.s32.totalorder %s4005_s24, 0  ;;  %p123_p3 = scmp.ne.s32.totalorder %s3997_s22, %s3993_s21 }
   0xc   : > { %s4085_s29 = scalar_select %p108_p0, %s4001_s23, %s110_s28  }
   0xd   : > { %p4087_p4 = por %p118_p2, %p117_p1  ;;  %p4578_p5 = scmp.eq.s32.totalorder %s4072_s25, 0 }
   0xe   : > { %p2961_p6 = scmp.ge.s32.totalorder %s4005_s24, 1  ;;  %p186_p7 = scmp.lt.s32.totalorder %s4005_s24, 3 }
   0xf   : > { %p4096_p8 = por %p4578_p5, %p123_p3  ;;  %s4007_s9 = smov [#allocation3]  }
  0x10   : > { %p4101_p10 = pnand %p2961_p6, %p186_p7  ;;  %s199_s10 = sshll.u32 %s4007_s9, 4  ;;  %s200_s10 = int_to_ptr.vmem [resolvable:$true] %s199_s10 }
  0x11   : > { %s4590_s7 = scalar_select %p4096_p8, 1, 0 }
  0x12   : > { %s4591_s8 = scalar_select %p4101_p10, 1, 0 }
  0x13   : > { %p3301_p11 = pneg %p4101_p10  ;;  %p3325_p12 = scmp.lt.s32.totalorder %s4005_s24, 2 }
  0x14   : > { %s4008_s12 = smov [#allocation5]   ;;  %s4594_s0 = sld [smem:[#allocation16_spill]] }
  0x15   : > { %p4110_p13 = pnand %p3301_p11, %p4578_p5  ;;  %s209_s13 = sshll.u32 %s4008_s12, 4  ;;  %s4120_s13 = int_to_ptr.vmem [resolvable:$true] %s209_s13 }
  0x16   : > { %p4116_p0 = pnand %p3325_p12, %p4087_p4 }
  0x17   : > { %s4592_s11 = scalar_select %p4110_p13, 1, 0 }
  0x18   : > { %s4593_s14 = scalar_select %p4116_p0, 1, 0 }
  0x19   : > { %p4130_p2 = pneg %p4110_p13 }
  0x1a   : > { %s3787_s17 = scalar_lea.hbm %s4594_s0, 128 }
  0x1b   : > { %p3788_p1 = scmp.ne.s32.totalorder %s4594_s0, %s3787_s17  ;;  %p3794_p6 = scmp.lt.u32.totalorder %s3787_s17, %s4594_s0 }
  0x1d   : > { %p3790_p3 = pnand %p4130_p2, %p3788_p1 }
  0x1f   : > { %p3791_p4 = pneg %p3790_p3 }
  0x21   : > { %p3796_p7 = pnand %p3794_p6, %p3791_p4 }
  0x23   : > { %3799 = shalt.err (!%p3796_p7)
}
  0x24   : > { %s3800_s28 = scalar_lea.vmem %s200_s10, 128  ;;  %p3808_p5 = scmp.lt.s32.totalorder %s200_s10, %s200_s10 }
  0x25   : > { %p3801_p11 = scmp.ne.s32.totalorder %s200_s10, %s3800_s28  ;;  %p3809_p8 = scmp.lt.s32.totalorder %s3800_s28, %s3800_s28 }
  0x27   : > { %p3803_p12 = pnand %p3801_p11, %p4130_p2  ;;  %p3810_p10 = por %p3809_p8, %p3808_p5 }
  0x29   : > { %p3804_p9 = pneg %p3803_p12 }
  0x2b   : > { %p3811_p0 = pnand %p3810_p10, %p3804_p9 }
  0x2d   : > { %3814 = shalt.err (!%p3811_p0)
}
  0x2e   : > { %3304 = dma.hbm_to_vmem [thread:$0]  (!%p4110_p13), %s4594_s0, 128, %s200_s10, [#allocation4]  }
  0x2f   : > { %s4596_s1 = sld [smem:[#allocation17_spill]] }
  0x35   : > { %s3815_s16 = scalar_lea.hbm %s4596_s1, 1024 }
  0x36   : > { %p3816_p1 = scmp.ne.s32.totalorder %s4596_s1, %s3815_s16  ;;  %p3822_p8 = scmp.lt.u32.totalorder %s3815_s16, %s4596_s1 }
  0x38   : > { %p3818_p3 = pnand %p3816_p1, %p4130_p2 }
  0x3a   : > { %p3819_p5 = pneg %p3818_p3 }
  0x3c   : > { %p3824_p9 = pnand %p3822_p8, %p3819_p5 }
  0x3e   : > { %3827 = shalt.err (!%p3824_p9)
}
  0x3f   : > { %s3828_s10 = scalar_lea.vmem %s4120_s13, 1024  ;;  %p3836_p6 = scmp.lt.s32.totalorder %s4120_s13, %s4120_s13 }
  0x40   : > { %p3829_p10 = scmp.ne.s32.totalorder %s4120_s13, %s3828_s10  ;;  %p3837_p7 = scmp.lt.s32.totalorder %s3828_s10, %s3828_s10 }
  0x42   : > { %p3831_p0 = pnand %p3829_p10, %p4130_p2  ;;  %p3838_p11 = por %p3837_p7, %p3836_p6 }
  0x44   : > { %p3832_p4 = pneg %p3831_p0 }
  0x46   : > { %p3839_p12 = pnand %p3838_p11, %p3832_p4 }
  0x48   : > { %3842 = shalt.err (!%p3839_p12)
}
  0x49   : > { %s4009_s27 = smov 256   ;;  %s4010_s28 = smov 16  }
  0x4a   : > { %3307 = dma.hbm_to_vmem [thread:$0]  (!%p4110_p13), %s4596_s1, 1024, %s4120_s13, [#allocation6], %s4009_s27, %s4009_s27, %s4010_s28  }
  0x4b   : > { %s247_s12 = sand.u32 1, %s4005_s24   ;;  %s4582_s15 = sand.u32 1, %s4001_s23  }
  0x4c   : > { %s2967_s16 = sshll.u32 %s4582_s15, 10  ;;  %s3257_s17 = sshll.u32 %s4005_s24, 8 }
  0x4d   : > { %s4597_s4 = sld [smem:[#allocation18_spill]]  ;;  %s251_s10 = scalar_lea.vmem [#allocation10], %s2967_s16 }
  0x4e   : > { %s258_s0 = sshll.u32 %s251_s10, 4  ;;  %s4184_s30 = scalar_lea.sflag [#allocation4], %s247_s12  ;;  %s4182_s0 = int_to_ptr.vmem [resolvable:$true] %s258_s0 }
  0x4f   : > { %p4598_p3 = scmp.ne.s32.totalorder %s4593_s14, 0 }
  0x51   : > { %p4585_p5 = pneg %p4598_p3 }
  0x53   : > { %s4180_s21 = scalar_lea.hbm %s4597_s4, %s3257_s17  ;;  %s3848_s18 = scalar_lea.hbm %s4597_s4, 32768 }
  0x54   : > { %s3843_s13 = scalar_lea.hbm %s4180_s21, 16384  ;;  %p3849_p10 = scmp.lt.u32.totalorder %s4180_s21, %s4597_s4 }
  0x55   : > { %p3844_p1 = scmp.ne.s32.totalorder %s4180_s21, %s3843_s13  ;;  %p3850_p0 = scmp.lt.u32.totalorder %s3848_s18, %s3843_s13 }
  0x56   : > { %p3852_p6 = scmp.lt.u32.totalorder %s3843_s13, %s4180_s21 }
  0x57   : > { %p3846_p8 = pnand %p4585_p5, %p3844_p1  ;;  %p3851_p4 = por %p3850_p0, %p3849_p10 }
  0x59   : > { %p3847_p9 = pneg %p3846_p8  ;;  %p3853_p7 = por %p3852_p6, %p3851_p4 }
  0x5b   : > { %p3854_p11 = pnand %p3853_p7, %p3847_p9 }
  0x5d   : > { %3857 = shalt.err (!%p3854_p11)
}
  0x5e   : > { %s3858_s12 = scalar_lea.vmem %s4182_s0, 16384  ;;  %s4011_s16 = smov [#allocation10]  }
  0x5f   : > { %p3859_p12 = scmp.ne.s32.totalorder %s4182_s0, %s3858_s12  ;;  %s3863_s10 = sshll.u32 %s4011_s16, 4  ;;  %s3864_s10 = int_to_ptr.vmem [resolvable:$false] %s3863_s10 }
  0x60   : > { %s3865_s15 = scalar_lea.vmem %s3864_s10, 32768  ;;  %p3866_p13 = scmp.lt.s32.totalorder %s4182_s0, %s3864_s10 }
  0x61   : > { %p3861_p1 = pnand %p3859_p12, %p4585_p5  ;;  %p3867_p10 = scmp.lt.s32.totalorder %s3865_s15, %s3858_s12 }
  0x63   : > { %p3862_p8 = pneg %p3861_p1  ;;  %p3868_p0 = por %p3867_p10, %p3866_p13 }
  0x65   : > { %p3869_p4 = pnand %p3868_p0, %p3862_p8 }
  0x67   : > { %3872 = shalt.err (!%p3869_p4)
}
  0x68   : > { %s4012_s13 = smov 512   ;;  %s4013_s9 = smov [#allocation7]  }
  0x69   : > { %3317 = dma.hbm_to_vmem [thread:$0]  (!%p4598_p3), %s4180_s21, 16384, %s4182_s0, %s4184_s30, %s4012_s13, %s4009_s27, %s4010_s28  }
  0x6a   : > { %s222_s17 = sshll.u32 %s4013_s9, 4  ;;  %s4014_s18 = smov [#allocation8]   ;;  %s223_s17 = int_to_ptr.vmem [resolvable:$true] %s222_s17 }
  0x6b   : > { %s236_s19 = sshll.u32 %s4014_s18, 4  ;;  %s3873_s10 = scalar_lea.hbm %s4573_s2, 16384  ;;  %s4214_s19 = int_to_ptr.vmem [resolvable:$true] %s236_s19 }
  0x6c   : > { %p3874_p13 = scmp.ne.s32.totalorder %s4573_s2, %s3873_s10  ;;  %p3880_p7 = scmp.lt.u32.totalorder %s3873_s10, %s4573_s2 }
  0x6e   : > { %p3876_p9 = pnand %p3874_p13, %p4130_p2 }
  0x70   : > { %p3877_p6 = pneg %p3876_p9 }
  0x72   : > { %p3882_p11 = pnand %p3880_p7, %p3877_p6 }
  0x74   : > { %3885 = shalt.err (!%p3882_p11)
}
  0x75   : > { %s3886_s21 = scalar_lea.vmem %s223_s17, 16384  ;;  %p3894_p10 = scmp.lt.s32.totalorder %s223_s17, %s223_s17 }
  0x76   : > { %p3887_p12 = scmp.ne.s32.totalorder %s223_s17, %s3886_s21  ;;  %p3895_p0 = scmp.lt.s32.totalorder %s3886_s21, %s3886_s21 }
  0x78   : > { %p3889_p1 = pnand %p3887_p12, %p4130_p2  ;;  %p3896_p4 = por %p3895_p0, %p3894_p10 }
  0x7a   : > { %p3890_p8 = pneg %p3889_p1 }
  0x7c   : > { %p3897_p5 = pnand %p3896_p4, %p3890_p8 }
  0x7e   : > { %3900 = shalt.err (!%p3897_p5)
}
  0x7f   : > { %p4599_p13 = scmp.ne.s32.totalorder %s4592_s11, 0  ;;  %s3901_s18 = scalar_lea.hbm %s4574_s3, 512 }
  0x80   : > { %p3902_p9 = scmp.ne.s32.totalorder %s4574_s3, %s3901_s18  ;;  %p3908_p7 = scmp.lt.u32.totalorder %s3901_s18, %s4574_s3 }
  0x81   : > { %3310 = dma.hbm_to_vmem [thread:$0]  (!%p4599_p13), %s4573_s2, 16384, %s223_s17, [#allocation6], %s4009_s27, %s4009_s27, %s4010_s28  }
  0x82   : > { %p3904_p5 = pnand %p3902_p9, %p4130_p2 }
  0x84   : > { %p3905_p6 = pneg %p3904_p5 }
  0x86   : > { %p3910_p11 = pnand %p3908_p7, %p3905_p6 }
  0x88   : > { %3913 = shalt.err (!%p3910_p11)
}
  0x89   : > { %s3914_s27 = scalar_lea.vmem %s4214_s19, 512  ;;  %p3922_p10 = scmp.lt.s32.totalorder %s4214_s19, %s4214_s19 }
  0x8a   : > { %p3915_p12 = scmp.ne.s32.totalorder %s4214_s19, %s3914_s27  ;;  %p3923_p0 = scmp.lt.s32.totalorder %s3914_s27, %s3914_s27 }
  0x8c   : > { %p3917_p1 = pnand %p3915_p12, %p4130_p2  ;;  %p3924_p4 = por %p3923_p0, %p3922_p10 }
  0x8e   : > { %p3918_p8 = pneg %p3917_p1 }
  0x90   : > { %p3925_p9 = pnand %p3924_p4, %p3918_p8 }
  0x92   : > { %3928 = shalt.err (!%p3925_p9)
}
  0x93   : > { %3313 = dma.hbm_to_vmem [thread:$0]  (!%p4599_p13), %s4574_s3, 512, %s4214_s19, [#allocation9]  }
  0x94   : > { %s4600_s0 = sand.u32 1, %s4001_s23   ;;  %s3258_s21 = sshll.u32 %s4005_s24, 6 }
  0x95   : > { %s2970_s20 = sshll.u32 %s4600_s0, 2  ;;  %s4266_s13 = scalar_lea.hbm %s4576_s5, %s3258_s21 }
  0x96   : > { %s272_s11 = scalar_lea.vmem [#allocation11], %s2970_s20  ;;  %s3929_s18 = scalar_lea.hbm %s4266_s13, 64 }
  0x97   : > { %s280_s9 = sshll.u32 %s272_s11, 4  ;;  %p3930_p2 = scmp.ne.s32.totalorder %s4266_s13, %s3929_s18  ;;  %s281_s9 = int_to_ptr.vmem [resolvable:$true] %s280_s9 }
  0x98   : > { %p4601_p5 = pneg %p4598_p3  ;;  %s3934_s12 = scalar_lea.hbm %s4576_s5, 128 }
  0x99   : > { %p3935_p7 = scmp.lt.u32.totalorder %s4266_s13, %s4576_s5  ;;  %p3936_p11 = scmp.lt.u32.totalorder %s3934_s12, %s3929_s18 }
  0x9a   : > { %p3932_p13 = pnand %p3930_p2, %p4601_p5  ;;  %p3938_p1 = scmp.lt.u32.totalorder %s3929_s18, %s4266_s13 }
  0x9b   : > { %p3937_p12 = por %p3936_p11, %p3935_p7 }
  0x9c   : > { %p3933_p6 = pneg %p3932_p13 }
  0x9d   : > { %p3939_p8 = por %p3938_p1, %p3937_p12 }
  0x9f   : > { %p3940_p10 = pnand %p3939_p8, %p3933_p6 }
  0xa1   : > { %3943 = shalt.err (!%p3940_p10)
}
  0xa2   : > { %s3944_s15 = scalar_lea.vmem %s281_s9, 64  ;;  %p4602_p4 = pmov %p4601_p5 }
  0xa3   : > { %p3945_p0 = scmp.ne.s32.totalorder %s281_s9, %s3944_s15  ;;  %s4015_s27 = smov [#allocation11]  }
  0xa4   : > { %s3949_s28 = sshll.u32 %s4015_s27, 4  ;;  %s3950_s28 = int_to_ptr.vmem [resolvable:$false] %s3949_s28 }
  0xa5   : > { %p3947_p9 = pnand %p3945_p0, %p4602_p4  ;;  %s3951_s17 = scalar_lea.vmem %s3950_s28, 128 }
  0xa6   : > { %p3952_p5 = scmp.lt.s32.totalorder %s281_s9, %s3950_s28  ;;  %p3953_p13 = scmp.lt.s32.totalorder %s3951_s17, %s3944_s15 }
  0xa7   : > { %p3948_p2 = pneg %p3947_p9 }
  0xa8   : > { %p3954_p7 = por %p3953_p13, %p3952_p5 }
  0xaa   : > { %p3955_p11 = pnand %p3954_p7, %p3948_p2 }
  0xac   : > { %3958 = shalt.err (!%p3955_p11)
}
  0xad   : > { %3320 = dma.hbm_to_vmem [thread:$0]  (!%p4598_p3), %s4266_s13, 64, %s281_s9, %s4184_s30  }
  0xae   : > { %p4603_p6 = scmp.ne.s32.totalorder %s4591_s8, 0 }
  0xaf   : > { %p4604_p12 = scmp.eq.s32.totalorder (!%p4603_p6), %s4072_s25, 0 }
  0xb0   : > { %289 = sbr.rel (%p4603_p6) target bundleno = 1181 (0x49d), region = 44 }
  0xb7   : > { %3976 = dma.done.wait (%p4604_p12), [#allocation4], 128   ;;  %p4605_p1 = pmov %p4604_p12 }
  0xb9   : > { %3978 = vsyncadd (%p4605_p1), [#allocation4], 4294967168  ;;  %p4606_p8 = pmov %p4605_p1 }
  0xba   : > { %p4607_p10 = pmov %p4605_p1 }
  0xbb   : > { %3980 = dma.done.wait (%p4606_p8), [#allocation6], 17408  }
  0xbc   : > { %3982 = vsyncadd (%p4607_p10), [#allocation6], 4294949888  ;;  %p4608_p0 = pmov %p4605_p1 }
  0xbe   : > { %3984 = dma.done.wait (%p4608_p0), [#allocation9], 512   ;;  %p4609_p3 = pmov %p4608_p0 }
  0xbf   : > { %s307_s8 = sand.u32 1, %s4072_s25   ;;  %s309_s14 = sand.u32 1, %s3997_s22  }
  0xc0   : > { %3986 = vsyncadd (%p4609_p3), [#allocation9], 4294966784  ;;  %s2978_s30 = sshll.u32 %s309_s14, 10  ;;  %s308_s0 = scalar_lea.sflag [#allocation4], %s307_s8 }
  0xc1   : > { %s4304_s20 = scalar_lea.vmem [#allocation10], %s2978_s30  ;;  %p4610_p4 = scmp.ne.s32.totalorder %s4590_s7, 0 }
  0xc3   : > { %3988 = dma.done.wait (%p4610_p4), %s308_s0, 16448  }
  0xc4   : > { %3990 = vsyncadd (%p4610_p4), %s308_s0, 4294950848  ;;  %s4310_s21 = sshll.u32 %s309_s14, 2  ;;  %s2980_s1 = sshll.u32 %s4072_s25, 2 }
  0xc5   : > { %p357_p9 = scmp.lt.s32.totalorder %s2980_s1, 7  ;;  %s320_s18 = scalar_lea.vmem [#allocation11], %s4310_s21 }
  0xc6   : > { %p4611_p2 = scmp.ne.s32.totalorder %s4072_s25, 0 }
  0xc7   : > { %s4617_s1 = smov (!%p357_p9, %s2980_s1), 7  ;;  %v3371_v0 = vld [vmem:[#allocation5 + $0x4] ss:$16 sps:$4 sm:$0xff] (!%p4611_p2)   ;;  %v3373_v1 = vld [vmem:[#allocation5 + $0xc] ss:$16 sps:$4 sm:$0xff] (!%p4611_p2)   ;;  %v4016_v2 = vmov (!%p4611_p2), 0  }
  0xc8   : > { %s2981_s4 = sshll.u32 %s4617_s1, 3  ;;  %366 = sbr.rel (%p4611_p2) target bundleno = 836 (0x344), region = 72  ;;  %453 = vmatprep.mubr.bf16.mxu0 (!%p4611_p2), %v4016_v2  ;;  %494 = vmatprep.mubr.bf16.mxu1 (!%p4611_p2), %v4016_v2  ;;  %v3375_v3 = vld [vmem:[#allocation5] ss:$16 sps:$4 sm:$0xff] (!%p4611_p2)   ;;  %v3376_v4 = vld [vmem:[#allocation5 + $0x8] ss:$16 sps:$4 sm:$0xff] (!%p4611_p2)  }
  0xc9   : > { %s4316_s9 = scalar_lea.vmem %s4577_s6, %s2981_s4  ;;  %421 = vmatprep.subr.bf16.mxu0 (!%p4611_p2), %v3371_v0  ;;  %462 = vmatprep.subr.bf16.mxu1 (!%p4611_p2), %v3373_v1  ;;  %v3377_v5 = vld [vmem:[#allocation5 + $0x24] ss:$16 sps:$4 sm:$0xff] (!%p4611_p2)   ;;  %v3379_v6 = vld [vmem:[#allocation5 + $0x2c] ss:$16 sps:$4 sm:$0xff] (!%p4611_p2)   ;;  %v3381_v7 = vld [vmem:[#allocation5 + $0x20] ss:$16 sps:$4 sm:$0xff] (!%p4611_p2)  }
  0xca   : > { %422 = vmatpush1.bf16.msra.mxu0 (!%p4611_p2), %v3375_v3  ;;  %463 = vmatpush1.bf16.msra.mxu1 (!%p4611_p2), %v3376_v4  ;;  %v3382_v8 = vld [vmem:[#allocation5 + $0x28] ss:$16 sps:$4 sm:$0xff] (!%p4611_p2)   ;;  %vm417_vm0 = vcmask (!%p4611_p2), 261120   ;;  %v3385_v11 = vld [vmem:[#allocation7 + $0x4] ss:$16 sps:$4 sm:$0xff] (!%p4611_p2)  }
  0xcb   : > { %423 = vmatprep.subr.bf16.mxu0 (!%p4611_p2), %v3377_v5  ;;  %v367_v9 = vld [vmem:[#allocation3] sm:$0xff] (!%p4611_p2)  ;;  %464 = vmatprep.subr.bf16.mxu1 (!%p4611_p2), %v3379_v6  ;;  %v3383_v13 = vld [vmem:[#allocation7] ss:$16 sps:$4 sm:$0xff] (!%p4611_p2)   ;;  %v3391_v15 = vld [vmem:[#allocation7 + $0x24] ss:$16 sps:$4 sm:$0xff] (!%p4611_p2)  }
  0xcc   : > { %v368_v10 = vpack.c.bf16 (!%p4611_p2), %v367_v9, %v367_v9  ;;  %v3388_v12 = vld [vmem:[#allocation7 + $0xc] ss:$16 sps:$4 sm:$0xff] (!%p4611_p2)   ;;  %v3386_v14 = vld [vmem:[#allocation7 + $0x8] ss:$16 sps:$4 sm:$0xff] (!%p4611_p2)   ;;  %v3389_v17 = vld [vmem:[#allocation7 + $0x20] ss:$16 sps:$4 sm:$0xff] (!%p4611_p2)  }
  0xcd   : > { %v3394_v16 = vld [vmem:[#allocation7 + $0x2c] ss:$16 sps:$4 sm:$0xff] (!%p4611_p2)   ;;  %v3392_v18 = vld [vmem:[#allocation7 + $0x28] ss:$16 sps:$4 sm:$0xff] (!%p4611_p2)   ;;  %v3397_v19 = vld [vmem:[#allocation7 + $0x44] ss:$16 sps:$4 sm:$0xff] (!%p4611_p2)  }
  0xce   : > { %424 = vmatpush1.bf16.msra.mxu0 (!%p4611_p2), %v3381_v7  ;;  %465 = vmatpush1.bf16.msra.mxu1 (!%p4611_p2), %v3382_v8  ;;  %v3400_v20 = vld [vmem:[#allocation7 + $0x4c] ss:$16 sps:$4 sm:$0xff] (!%p4611_p2)   ;;  %v3395_v21 = vld [vmem:[#allocation7 + $0x40] ss:$16 sps:$4 sm:$0xff] (!%p4611_p2)   ;;  %v3398_v22 = vld [vmem:[#allocation7 + $0x48] ss:$16 sps:$4 sm:$0xff] (!%p4611_p2)  }
  0xcf   : > { %1476 = vmatprep.subr.bf16.mxu0 %v3385_v11  ;;  %1558 = vmatprep.subr.bf16.mxu1 %v3388_v12  ;;  %v3403_v23 = vld [vmem:[#allocation7 + $0x64] ss:$16 sps:$4 sm:$0xff]   ;;  %v3406_v24 = vld [vmem:[#allocation7 + $0x6c] ss:$16 sps:$4 sm:$0xff]   ;;  %v3401_v25 = vld [vmem:[#allocation7 + $0x60] ss:$16 sps:$4 sm:$0xff]  }
  0xd0   : > { %v3404_v26 = vld [vmem:[#allocation7 + $0x68] ss:$16 sps:$4 sm:$0xff]   ;;  %v3409_v27 = vld [vmem:[#allocation7 + $0x84] ss:$16 sps:$4 sm:$0xff]   ;;  %v3412_v28 = vld [vmem:[#allocation7 + $0x8c] ss:$16 sps:$4 sm:$0xff]  }
  0xd1   : > { %2991 = vmatmul.mubr.msk.bf16.vlgmr.msra.gmra.mrb[0].mxu0 %vm417_vm0, %v368_v10  ;;  %2992 = vmatmul.mubr.msk.bf16.vlgmr.msra.gmra.mrb[0].mxu1 %vm417_vm0, %v368_v10  ;;  %v3407_v29 = vld [vmem:[#allocation7 + $0x80] ss:$16 sps:$4 sm:$0xff]   ;;  %v3410_v30 = vld [vmem:[#allocation7 + $0x88] ss:$16 sps:$4 sm:$0xff]   ;;  %v3415_v31 = vld [vmem:[#allocation7 + $0xa4] ss:$16 sps:$4 sm:$0xff]  }
  0xd2   : > { %1477 = vmatpush1.bf16.msra.mxu0 %v3383_v13  ;;  %1559 = vmatpush1.bf16.msra.mxu1 %v3386_v14  ;;  %v3418_v32 = vld [vmem:[#allocation7 + $0xac] ss:$16 sps:$4 sm:$0xff]   ;;  %v3413_v33 = vld [vmem:[#allocation7 + $0xa0] ss:$16 sps:$4 sm:$0xff]   ;;  %v3416_v34 = vld [vmem:[#allocation7 + $0xa8] ss:$16 sps:$4 sm:$0xff]  }
  0xd3   : > { %1478 = vmatprep.subr.bf16.mxu0 %v3391_v15  ;;  %1560 = vmatprep.subr.bf16.mxu1 %v3394_v16  ;;  %v3421_v35 = vld [vmem:[#allocation7 + $0xc4] ss:$16 sps:$4 sm:$0xff]   ;;  %v3424_v36 = vld [vmem:[#allocation7 + $0xcc] ss:$16 sps:$4 sm:$0xff]   ;;  %v3419_v37 = vld [vmem:[#allocation7 + $0xc0] ss:$16 sps:$4 sm:$0xff]  }
  0xd4   : > { %v3422_v38 = vld [vmem:[#allocation7 + $0xc8] ss:$16 sps:$4 sm:$0xff]   ;;  %v3427_v39 = vld [vmem:[#allocation7 + $0xe4] ss:$16 sps:$4 sm:$0xff]   ;;  %v3430_v40 = vld [vmem:[#allocation7 + $0xec] ss:$16 sps:$4 sm:$0xff]  }
  0xd5   : > { %v3425_v41 = vld [vmem:[#allocation7 + $0xe0] ss:$16 sps:$4 sm:$0xff]   ;;  %v3428_v42 = vld [vmem:[#allocation7 + $0xe8] ss:$16 sps:$4 sm:$0xff]   ;;  %v3433_v43 = vld [vmem:[#allocation7 + $0x104] ss:$16 sps:$4 sm:$0xff]  }
  0xd6   : > { %1479 = vmatpush1.bf16.msra.mxu0 %v3389_v17  ;;  %1561 = vmatpush1.bf16.msra.mxu1 %v3392_v18  ;;  %v3436_v44 = vld [vmem:[#allocation7 + $0x10c] ss:$16 sps:$4 sm:$0xff]   ;;  %v3431_v45 = vld [vmem:[#allocation7 + $0x100] ss:$16 sps:$4 sm:$0xff]   ;;  %v3434_v46 = vld [vmem:[#allocation7 + $0x108] ss:$16 sps:$4 sm:$0xff]  }
  0xd7   : > { %1480 = vmatprep.subr.bf16.mxu0 %v3397_v19  ;;  %1562 = vmatprep.subr.bf16.mxu1 %v3400_v20  ;;  %v3439_v47 = vld [vmem:[#allocation7 + $0x124] ss:$16 sps:$4 sm:$0xff]   ;;  %v3442_v48 = vld [vmem:[#allocation7 + $0x12c] ss:$16 sps:$4 sm:$0xff]   ;;  %v3437_v49 = vld [vmem:[#allocation7 + $0x120] ss:$16 sps:$4 sm:$0xff]  }
  0xd8   : > { %v3440_v50 = vld [vmem:[#allocation7 + $0x128] ss:$16 sps:$4 sm:$0xff]   ;;  %v3445_v51 = vld [vmem:[#allocation7 + $0x144] ss:$16 sps:$4 sm:$0xff]   ;;  %v3448_v52 = vld [vmem:[#allocation7 + $0x14c] ss:$16 sps:$4 sm:$0xff]  }
  0xd9   : > { %v3443_v53 = vld [vmem:[#allocation7 + $0x140] ss:$16 sps:$4 sm:$0xff]   ;;  %v3446_v54 = vld [vmem:[#allocation7 + $0x148] ss:$16 sps:$4 sm:$0xff]   ;;  %v3451_v55 = vld [vmem:[#allocation7 + $0x164] ss:$16 sps:$4 sm:$0xff]  }
  0xda   : > { %1481 = vmatpush1.bf16.msra.mxu0 %v3395_v21  ;;  %1563 = vmatpush1.bf16.msra.mxu1 %v3398_v22  ;;  %v3454_v56 = vld [vmem:[#allocation7 + $0x16c] ss:$16 sps:$4 sm:$0xff]   ;;  %v3449_v57 = vld [vmem:[#allocation7 + $0x160] ss:$16 sps:$4 sm:$0xff]   ;;  %v3452_v58 = vld [vmem:[#allocation7 + $0x168] ss:$16 sps:$4 sm:$0xff]  }
  0xdb   : > { %1482 = vmatprep.subr.bf16.mxu0 %v3403_v23  ;;  %1564 = vmatprep.subr.bf16.mxu1 %v3406_v24  ;;  %v3457_v59 = vld [vmem:[#allocation7 + $0x184] ss:$16 sps:$4 sm:$0xff]   ;;  %v3460_v60 = vld [vmem:[#allocation7 + $0x18c] ss:$16 sps:$4 sm:$0xff]   ;;  %v3455_v61 = vld [vmem:[#allocation7 + $0x180] ss:$16 sps:$4 sm:$0xff]  }
  0xdc   : > { %v3458_v62 = vld [vmem:[#allocation7 + $0x188] ss:$16 sps:$4 sm:$0xff]   ;;  %v3463_v63 = vld [vmem:[#allocation7 + $0x1a4] ss:$16 sps:$4 sm:$0xff]   ;;  %v3461_v0 = vld [vmem:[#allocation7 + $0x1a0] ss:$16 sps:$4 sm:$0xff]  }
  0xdd   : > { %v3464_v1 = vld [vmem:[#allocation7 + $0x1a8] ss:$16 sps:$4 sm:$0xff]   ;;  %v3466_v2 = vld [vmem:[#allocation7 + $0x1ac] ss:$16 sps:$4 sm:$0xff]   ;;  %v3469_v3 = vld [vmem:[#allocation7 + $0x1c4] ss:$16 sps:$4 sm:$0xff]  }
  0xde   : > { %1483 = vmatpush1.bf16.msra.mxu0 %v3401_v25  ;;  %1565 = vmatpush1.bf16.msra.mxu1 %v3404_v26  ;;  %v3472_v4 = vld [vmem:[#allocation7 + $0x1cc] ss:$16 sps:$4 sm:$0xff]   ;;  %v3467_v5 = vld [vmem:[#allocation7 + $0x1c0] ss:$16 sps:$4 sm:$0xff]   ;;  %v3470_v6 = vld [vmem:[#allocation7 + $0x1c8] ss:$16 sps:$4 sm:$0xff]  }
  0xdf   : > { %1484 = vmatprep.subr.bf16.mxu0 %v3409_v27  ;;  %1566 = vmatprep.subr.bf16.mxu1 %v3412_v28  ;;  %v3475_v7 = vld [vmem:[#allocation7 + $0x1e4] ss:$16 sps:$4 sm:$0xff]   ;;  %v3478_v8 = vld [vmem:[#allocation7 + $0x1ec] ss:$16 sps:$4 sm:$0xff]   ;;  %v3473_v9 = vld [vmem:[#allocation7 + $0x1e0] ss:$16 sps:$4 sm:$0xff]  }
  0xe0   : > { %v3476_v10 = vld [vmem:[#allocation7 + $0x1e8] ss:$16 sps:$4 sm:$0xff]   ;;  %v3481_v11 = vld [vmem:[#allocation7 + $0x204] ss:$16 sps:$4 sm:$0xff]   ;;  %v3484_v12 = vld [vmem:[#allocation7 + $0x20c] ss:$16 sps:$4 sm:$0xff]  }
  0xe2   : > { %1485 = vmatpush1.bf16.msra.mxu0 %v3407_v29  ;;  %1567 = vmatpush1.bf16.msra.mxu1 %v3410_v30 }
  0xe3   : > { %1486 = vmatprep.subr.bf16.mxu0 %v3415_v31  ;;  %1568 = vmatprep.subr.bf16.mxu1 %v3418_v32 }
  0xe6   : > { %1487 = vmatpush1.bf16.msra.mxu0 %v3413_v33  ;;  %1569 = vmatpush1.bf16.msra.mxu1 %v3416_v34 }
  0xe7   : > { %1488 = vmatprep.subr.bf16.mxu0 %v3421_v35  ;;  %1570 = vmatprep.subr.bf16.mxu1 %v3424_v36 }
  0xea   : > { %1489 = vmatpush1.bf16.msra.mxu0 %v3419_v37  ;;  %1571 = vmatpush1.bf16.msra.mxu1 %v3422_v38 }
  0xeb   : > { %1490 = vmatprep.subr.bf16.mxu0 %v3427_v39  ;;  %1572 = vmatprep.subr.bf16.mxu1 %v3430_v40 }
  0xee   : > { %1491 = vmatpush1.bf16.msra.mxu0 %v3425_v41  ;;  %1573 = vmatpush1.bf16.msra.mxu1 %v3428_v42 }
  0xef   : > { %1492 = vmatprep.subr.bf16.mxu0 %v3433_v43  ;;  %1574 = vmatprep.subr.bf16.mxu1 %v3436_v44 }
  0xf2   : > { %1493 = vmatpush1.bf16.msra.mxu0 %v3431_v45  ;;  %1575 = vmatpush1.bf16.msra.mxu1 %v3434_v46 }
  0xf3   : > { %1494 = vmatprep.subr.bf16.mxu0 %v3439_v47  ;;  %1576 = vmatprep.subr.bf16.mxu1 %v3442_v48 }
  0xf6   : > { %1495 = vmatpush1.bf16.msra.mxu0 %v3437_v49  ;;  %1577 = vmatpush1.bf16.msra.mxu1 %v3440_v50 }
  0xf7   : > { %1496 = vmatprep.subr.bf16.mxu0 %v3445_v51  ;;  %1578 = vmatprep.subr.bf16.mxu1 %v3448_v52 }
  0xfa   : > { %1497 = vmatpush1.bf16.msra.mxu0 %v3443_v53  ;;  %1579 = vmatpush1.bf16.msra.mxu1 %v3446_v54 }
  0xfb   : > { %1498 = vmatprep.subr.bf16.mxu0 %v3451_v55  ;;  %1580 = vmatprep.subr.bf16.mxu1 %v3454_v56 }
  0xfe   : > { %1499 = vmatpush1.bf16.msra.mxu0 %v3449_v57  ;;  %1581 = vmatpush1.bf16.msra.mxu1 %v3452_v58 }
  0xff   : > { %1500 = vmatprep.subr.bf16.mxu0 %v3457_v59  ;;  %1582 = vmatprep.subr.bf16.mxu1 %v3460_v60 }
 0x102   : > { %1501 = vmatpush1.bf16.msra.mxu0 %v3455_v61  ;;  %1583 = vmatpush1.bf16.msra.mxu1 %v3458_v62 }
 0x103   : > { %1502 = vmatprep.subr.bf16.mxu0 %v3463_v63  ;;  %1584 = vmatprep.subr.bf16.mxu1 %v3466_v2 }
 0x106   : > { %1503 = vmatpush1.bf16.msra.mxu0 %v3461_v0  ;;  %1585 = vmatpush1.bf16.msra.mxu1 %v3464_v1 }
 0x107   : > { %1504 = vmatprep.subr.bf16.mxu0 %v3469_v3  ;;  %1586 = vmatprep.subr.bf16.mxu1 %v3472_v4 }
 0x10a   : > { %1505 = vmatpush1.bf16.msra.mxu0 %v3467_v5  ;;  %1587 = vmatpush1.bf16.msra.mxu1 %v3470_v6 }
 0x10b   : > { %1506 = vmatprep.subr.bf16.mxu0 %v3475_v7  ;;  %1588 = vmatprep.subr.bf16.mxu1 %v3478_v8 }
 0x10e   : > { %1507 = vmatpush1.bf16.msra.mxu0 %v3473_v9  ;;  %1589 = vmatpush1.bf16.msra.mxu1 %v3476_v10 }
 0x10f   : > { %1517 = vmatprep.subr.bf16.mxu0 %v3481_v11  ;;  %1599 = vmatprep.subr.bf16.mxu1 %v3484_v12 }
 0x1a4   : > { %v4321_v13 = vpop.f32.mrb[0].mxu0  ;;  %v4323_v14 = vpop.f32.mrb[0].mxu1 }
 0x1a5   : > { %v506_v15 = vrot.slane %v4321_v13, 4  ;;  %v530_v16 = vmul.f32 %v4321_v13, %v4321_v13  ;;  %v518_v17 = vrot.slane %v4323_v14, 4  ;;  %v532_v18 = vmul.f32 %v4323_v14, %v4323_v14  ;;  %v4331_v19 = vpop.f32.mrb[1].mxu0  ;;  %v4333_v20 = vpop.f32.mrb[1].mxu1 }
 0x1a6   : > { %v512_v21 = vrot.slane %v4331_v19, 4  ;;  %v531_v22 = vmul.f32 %v4331_v19, %v4331_v19  ;;  %v524_v23 = vrot.slane %v4333_v20, 4  ;;  %v533_v24 = vmul.f32 %v4333_v20, %v4333_v20  ;;  %v459_v25 = vpop.f32.mrb[2].mxu0  ;;  %v500_v26 = vpop.f32.mrb[2].mxu1 }
 0x1a7   : > { %v507_v27 = vadd.f32 %v506_v15, %v4321_v13  ;;  %v534_v28 = vrot.slane %v530_v16, 4  ;;  %v519_v29 = vadd.f32 %v518_v17, %v4323_v14  ;;  %v546_v30 = vrot.slane %v532_v18, 4  ;;  %v460_v31 = vpop.f32.mrb[3].mxu0  ;;  %v501_v32 = vpop.f32.mrb[3].mxu1 }
 0x1a8   : > { %v513_v33 = vadd.f32 %v512_v21, %v4331_v19  ;;  %v540_v34 = vrot.slane %v531_v22, 4  ;;  %v525_v35 = vadd.f32 %v524_v23, %v4333_v20  ;;  %v552_v36 = vrot.slane %v533_v24, 4 }
 0x1a9   : > { %v508_v37 = vrot.slane %v507_v27, 2  ;;  %v535_v38 = vadd.f32 %v534_v28, %v530_v16  ;;  %v520_v39 = vrot.slane %v519_v29, 2  ;;  %v547_v40 = vadd.f32 %v546_v30, %v532_v18 }
 0x1aa   : > { %v514_v41 = vrot.slane %v513_v33, 2  ;;  %v541_v42 = vadd.f32 %v540_v34, %v531_v22  ;;  %v526_v43 = vrot.slane %v525_v35, 2  ;;  %v553_v44 = vadd.f32 %v552_v36, %v533_v24 }
 0x1ab   : > { %v509_v45 = vadd.f32 %v508_v37, %v507_v27  ;;  %v536_v46 = vrot.slane %v535_v38, 2  ;;  %v521_v47 = vadd.f32 %v520_v39, %v519_v29  ;;  %v548_v48 = vrot.slane %v547_v40, 2 }
 0x1ac   : > { %v515_v49 = vadd.f32 %v514_v41, %v513_v33  ;;  %v542_v50 = vrot.slane %v541_v42, 2  ;;  %v527_v51 = vadd.f32 %v526_v43, %v525_v35  ;;  %v554_v52 = vrot.slane %v553_v44, 2 }
 0x1ad   : > { %v510_v53 = vrot.slane %v509_v45, 1  ;;  %v537_v54 = vadd.f32 %v536_v46, %v535_v38  ;;  %v522_v55 = vrot.slane %v521_v47, 1  ;;  %v549_v56 = vadd.f32 %v548_v48, %v547_v40 }
 0x1ae   : > { %v516_v57 = vrot.slane %v515_v49, 1  ;;  %v543_v58 = vadd.f32 %v542_v50, %v541_v42  ;;  %v528_v59 = vrot.slane %v527_v51, 1  ;;  %v555_v60 = vadd.f32 %v554_v52, %v553_v44  ;;  %v503_v52 = vld [vmem:[#allocation8] ss:$8 sm:$0xf] }
 0x1af   : > { %v511_v61 = vadd.f32 %v510_v53, %v509_v45  ;;  %v538_v62 = vrot.slane %v537_v54, 1  ;;  %v523_v63 = vadd.f32 %v522_v55, %v521_v47  ;;  %v550_v0 = vrot.slane %v549_v56, 1 }
 0x1b0   : > { %v517_v1 = vadd.f32 %v516_v57, %v515_v49  ;;  %v544_v2 = vrot.slane %v543_v58, 1  ;;  %v529_v3 = vadd.f32 %v528_v59, %v527_v51  ;;  %v556_v4 = vrot.slane %v555_v60, 1 }
 0x1b1   : > { %v539_v5 = vadd.f32 %v538_v62, %v537_v54  ;;  %v558_v6 = vmul.f32 0.125, %v511_v61  ;;  %v551_v7 = vadd.f32 %v550_v0, %v549_v56  ;;  %v560_v8 = vmul.f32 0.125, %v523_v63 }
 0x1b2   : > { %v545_v9 = vadd.f32 %v544_v2, %v543_v58  ;;  %v559_v10 = vmul.f32 0.125, %v517_v1  ;;  %v557_v11 = vadd.f32 %v556_v4, %v555_v60  ;;  %v561_v12 = vmul.f32 0.125, %v529_v3 }
 0x1b3   : > { %v562_v15 = vmul.f32 0.125, %v539_v5  ;;  %v566_v16 = vmul.f32 %v558_v6, %v558_v6  ;;  %v564_v17 = vmul.f32 0.125, %v551_v7  ;;  %v568_v18 = vmul.f32 %v560_v8, %v560_v8 }
 0x1b4   : > { %v563_v21 = vmul.f32 0.125, %v545_v9  ;;  %v567_v22 = vmul.f32 %v559_v10, %v559_v10  ;;  %v565_v23 = vmul.f32 0.125, %v557_v11  ;;  %v569_v24 = vmul.f32 %v561_v12, %v561_v12 }
 0x1b5   : > { %v570_v25 = vsub.f32 %v562_v15, %v566_v16  ;;  %v572_v26 = vsub.f32 %v564_v17, %v568_v18  ;;  %v4017_v37 = vmov 1966171168   ;;  %v595_v39 = vlaneseq  ;;  %v505_v18 = vld [vmem:[#allocation8 + $0x1] ss:$8 sm:$0xf] }
 0x1b6   : > { %v571_v27 = vsub.f32 %v563_v21, %v567_v22  ;;  %v573_v28 = vsub.f32 %v565_v23, %v569_v24  ;;  %v593_v38 = vunpack.c.l.s4 %v4017_v37  ;;  %v3491_v37 = vld [vmem:[#allocation7 + $0x240] ss:$16 sps:$4 sm:$0xff]  }
 0x1b7   : > { %v574_v29 = vmax.f32 %v570_v25, 0.0  ;;  %v576_v30 = vmax.f32 %v572_v26, 0.0  ;;  %v596_v41 = vshrl.u32 %v595_v39, 7  ;;  %v3499_v39 = vld [vmem:[#allocation7 + $0x264] ss:$16 sps:$4 sm:$0xff]  }
 0x1b8   : > { %v575_v31 = vmax.f32 %v571_v27, 0.0  ;;  %v577_v32 = vmax.f32 %v573_v28, 0.0  ;;  %v594_v40 = vunpack.c.0.s8 %v593_v38  ;;  %v3479_v27 = vld [vmem:[#allocation7 + $0x200] ss:$16 sps:$4 sm:$0xff]   ;;  %v3482_v28 = vld [vmem:[#allocation7 + $0x208] ss:$16 sps:$4 sm:$0xff]  }
 0x1b9   : > { %v578_v33 = vadd.f32 1e-05, %v574_v29  ;;  %v580_v34 = vadd.f32 1e-05, %v576_v30  ;;  %v4349_v53 = vsub.s32 2, %v596_v41  ;;  %v4352_v55 = vsub.s32 3, %v596_v41 }
 0x1ba   : > { %v579_v35 = vadd.f32 1e-05, %v575_v31  ;;  %v581_v36 = vadd.f32 1e-05, %v577_v32  ;;  %v4345_v44 = vsub.s32 %v594_v40, %v596_v41  ;;  %v4354_v56 = vsub.s32 0, %v596_v41 }
 0x1bb   : > { %3575 = vrsqrt.f32 %v578_v33  ;;  %v4356_v57 = vsub.s32 1, %v596_v41  ;;  %v3487_v30 = vld [vmem:[#allocation7 + $0x224] ss:$16 sps:$4 sm:$0xff]   ;;  %v3490_v31 = vld [vmem:[#allocation7 + $0x22c] ss:$16 sps:$4 sm:$0xff]  }
 0x1bc   : > { %3577 = vrsqrt.f32 %v580_v34  ;;  %v3485_v33 = vld [vmem:[#allocation7 + $0x220] ss:$16 sps:$4 sm:$0xff]   ;;  %v3488_v34 = vld [vmem:[#allocation7 + $0x228] ss:$16 sps:$4 sm:$0xff]   ;;  %v3502_v40 = vld [vmem:[#allocation7 + $0x26c] ss:$16 sps:$4 sm:$0xff]  }
 0x1bd   : > { %3579 = vrsqrt.f32 %v579_v35  ;;  %v3493_v35 = vld [vmem:[#allocation7 + $0x244] ss:$16 sps:$4 sm:$0xff]   ;;  %v3494_v38 = vld [vmem:[#allocation7 + $0x248] ss:$16 sps:$4 sm:$0xff]   ;;  %v3497_v41 = vld [vmem:[#allocation7 + $0x260] ss:$16 sps:$4 sm:$0xff]  }
 0x1be   : > { %3581 = vrsqrt.f32 %v581_v36  ;;  %v3496_v36 = vld [vmem:[#allocation7 + $0x24c] ss:$16 sps:$4 sm:$0xff]  }
 0x1c5   : > { %v3576_v42 = vpop.eup %3575 }
 0x1c6   : > { %v3578_v43 = vpop.eup %3577 }
 0x1c7   : > { %v3580_v45 = vpop.eup %3579 }
 0x1c8   : > { %v3582_v46 = vpop.eup %3581  ;;  %v590_v47 = vcombine.low %v3576_v42, %v3580_v45  ;;  %v3500_v42 = vld [vmem:[#allocation7 + $0x268] ss:$16 sps:$4 sm:$0xff]   ;;  %v3508_v45 = vld [vmem:[#allocation7 + $0x28c] ss:$16 sps:$4 sm:$0xff]  }
 0x1c9   : > { %v591_v48 = vcombine.low %v3578_v43, %v3582_v46  ;;  %v3505_v43 = vld [vmem:[#allocation7 + $0x284] ss:$16 sps:$4 sm:$0xff]   ;;  %v3503_v46 = vld [vmem:[#allocation7 + $0x280] ss:$16 sps:$4 sm:$0xff]  }
 0x1ca   : > { %v598_v49 = vrot.slane %v590_v47, %v4345_v44  ;;  %v3506_v47 = vld [vmem:[#allocation7 + $0x288] ss:$16 sps:$4 sm:$0xff]  }
 0x1cb   : > { %v605_v50 = vrot.slane %v591_v48, %v4345_v44  ;;  %v3511_v48 = vld [vmem:[#allocation7 + $0x2a4] ss:$16 sps:$4 sm:$0xff]  }
 0x1cd   : > { %v606_v51 = vcombine.low %v598_v49, %v605_v50  ;;  %v3514_v49 = vld [vmem:[#allocation7 + $0x2ac] ss:$16 sps:$4 sm:$0xff]   ;;  %v3509_v50 = vld [vmem:[#allocation7 + $0x2a0] ss:$16 sps:$4 sm:$0xff]  }
 0x1cf   : > { %v613_v54 = vrot.slane %v606_v51, %v4345_v44  ;;  %v3512_v51 = vld [vmem:[#allocation7 + $0x2a8] ss:$16 sps:$4 sm:$0xff]  }
 0x1d1   : > { %v615_v58 = vmul.f32 %v613_v54, %v503_v52  ;;  %v3517_v52 = vld [vmem:[#allocation7 + $0x2c4] ss:$16 sps:$4 sm:$0xff]   ;;  %v3520_v54 = vld [vmem:[#allocation7 + $0x2cc] ss:$16 sps:$4 sm:$0xff]  }
 0x1d3   : > { %v628_v59 = vrot.slane %v615_v58, %v4349_v53  ;;  %v632_v60 = vrot.slane %v615_v58, %v4352_v55  ;;  %v620_v61 = vrot.slane %v615_v58, %v4354_v56  ;;  %v624_v62 = vrot.slane %v615_v58, %v4356_v57  ;;  %v3515_v58 = vld [vmem:[#allocation7 + $0x2c0] ss:$16 sps:$4 sm:$0xff]  }
 0x1d5   : > { %v639_v63 = vmul.f32 %v628_v59, %v560_v8  ;;  %v640_v0 = vmul.f32 %v632_v60, %v561_v12  ;;  %v674_v1 = vmul.f32 %v632_v60, %v4333_v20  ;;  %v637_v2 = vmul.f32 %v620_v61, %v558_v6  ;;  %v3523_v60 = vld [vmem:[#allocation7 + $0x2e4] ss:$16 sps:$4 sm:$0xff]  }
 0x1d6   : > { %v638_v3 = vmul.f32 %v624_v62, %v559_v10  ;;  %v672_v4 = vmul.f32 %v624_v62, %v4331_v19  ;;  %v671_v5 = vmul.f32 %v620_v61, %v4321_v13  ;;  %v673_v7 = vmul.f32 %v628_v59, %v4323_v14  ;;  %v3518_v59 = vld [vmem:[#allocation7 + $0x2c8] ss:$16 sps:$4 sm:$0xff]   ;;  %v3526_v61 = vld [vmem:[#allocation7 + $0x2ec] ss:$16 sps:$4 sm:$0xff]   ;;  %v3521_v62 = vld [vmem:[#allocation7 + $0x2e0] ss:$16 sps:$4 sm:$0xff]  }
 0x1d7   : > { %v646_v9 = vcombine.low %v639_v63, %v640_v0  ;;  %v3524_v63 = vld [vmem:[#allocation7 + $0x2e8] ss:$16 sps:$4 sm:$0xff]   ;;  %v3529_v0 = vld [vmem:[#allocation7 + $0x304] ss:$16 sps:$4 sm:$0xff]  }
 0x1d8   : > { %v645_v11 = vcombine.low %v637_v2, %v638_v3  ;;  %v3527_v2 = vld [vmem:[#allocation7 + $0x300] ss:$16 sps:$4 sm:$0xff]   ;;  %v3530_v3 = vld [vmem:[#allocation7 + $0x308] ss:$16 sps:$4 sm:$0xff]  }
 0x1d9   : > { %v660_v15 = vrot.slane %v646_v9, %v4345_v44  ;;  %v3536_v9 = vld [vmem:[#allocation7 + $0x328] ss:$16 sps:$4 sm:$0xff]  }
 0x1da   : > { %v653_v16 = vrot.slane %v645_v11, %v4345_v44  ;;  %v3541_v11 = vld [vmem:[#allocation7 + $0x344] ss:$16 sps:$4 sm:$0xff]  }
 0x1dc   : > { %v661_v17 = vcombine.low %v653_v16, %v660_v15  ;;  %v3544_v15 = vld [vmem:[#allocation7 + $0x34c] ss:$16 sps:$4 sm:$0xff]   ;;  %v3539_v16 = vld [vmem:[#allocation7 + $0x340] ss:$16 sps:$4 sm:$0xff]  }
 0x1de   : > { %v668_v8 = vrot.slane %v661_v17, %v4345_v44  ;;  %v3542_v17 = vld [vmem:[#allocation7 + $0x348] ss:$16 sps:$4 sm:$0xff]  }
 0x1e0   : > { %v670_v12 = vsub.f32 %v505_v18, %v668_v8  ;;  %v3547_v18 = vld [vmem:[#allocation7 + $0x364] ss:$16 sps:$4 sm:$0xff]   ;;  %v3550_v8 = vld [vmem:[#allocation7 + $0x36c] ss:$16 sps:$4 sm:$0xff]  }
 0x1e2   : > { %v683_v20 = vrot.slane %v670_v12, %v4356_v57  ;;  %v679_v6 = vrot.slane %v670_v12, %v4354_v56  ;;  %v691_v19 = vrot.slane %v670_v12, %v4352_v55  ;;  %v687_v13 = vrot.slane %v670_v12, %v4349_v53  ;;  %v3545_v12 = vld [vmem:[#allocation7 + $0x360] ss:$16 sps:$4 sm:$0xff]  }
 0x1e4   : > { %v697_v14 = vadd.f32 %v683_v20, %v672_v4  ;;  %v696_v10 = vadd.f32 %v679_v6, %v671_v5  ;;  %v699_v21 = vadd.f32 %v691_v19, %v674_v1  ;;  %v4373_v22 = vadd.f32 %v687_v13, %v673_v7  ;;  %v3532_v1 = vld [vmem:[#allocation7 + $0x30c] ss:$16 sps:$4 sm:$0xff]   ;;  %v3535_v4 = vld [vmem:[#allocation7 + $0x324] ss:$16 sps:$4 sm:$0xff]   ;;  %v3533_v7 = vld [vmem:[#allocation7 + $0x320] ss:$16 sps:$4 sm:$0xff]  }
 0x1e5   : > { %v3538_v5 = vld [vmem:[#allocation7 + $0x32c] ss:$16 sps:$4 sm:$0xff]   ;;  %v3548_v20 = vld [vmem:[#allocation7 + $0x368] ss:$16 sps:$4 sm:$0xff]   ;;  %v3553_v6 = vld [vmem:[#allocation7 + $0x384] ss:$16 sps:$4 sm:$0xff]  }
 0x1e6   : > { %v701_v23 = vmax.f32 %v697_v14, 0.0  ;;  %v700_v24 = vmax.f32 %v696_v10, 0.0  ;;  %v703_v25 = vmax.f32 %v699_v21, 0.0  ;;  %v3556_v19 = vld [vmem:[#allocation7 + $0x38c] ss:$16 sps:$4 sm:$0xff]  }
 0x1e7   : > { %v3551_v13 = vld [vmem:[#allocation7 + $0x380] ss:$16 sps:$4 sm:$0xff]   ;;  %v3554_v14 = vld [vmem:[#allocation7 + $0x388] ss:$16 sps:$4 sm:$0xff]   ;;  %v3559_v10 = vld [vmem:[#allocation7 + $0x3a4] ss:$16 sps:$4 sm:$0xff]  }
 0x1e8   : > { %v705_v26 = vpack.c.bf16 %v701_v23, %v701_v23  ;;  %v704_v29 = vpack.c.bf16 %v700_v24, %v700_v24  ;;  %v707_v32 = vpack.c.bf16 %v703_v25, %v703_v25  ;;  %v3562_v21 = vld [vmem:[#allocation7 + $0x3ac] ss:$16 sps:$4 sm:$0xff]   ;;  %v3557_v23 = vld [vmem:[#allocation7 + $0x3a0] ss:$16 sps:$4 sm:$0xff]   ;;  %v3560_v24 = vld [vmem:[#allocation7 + $0x3a8] ss:$16 sps:$4 sm:$0xff]  }
 0x1e9   : > { %v3565_v25 = vld [vmem:[#allocation7 + $0x3c4] ss:$16 sps:$4 sm:$0xff]  }
 0x1ea   : > { %1508 = vmatprep.mubr.bf16.mxu0 %v705_v26  ;;  %1590 = vmatprep.mubr.bf16.mxu1 %v705_v26  ;;  %v3568_v26 = vld [vmem:[#allocation7 + $0x3cc] ss:$16 sps:$4 sm:$0xff]  }
 0x1eb   : > { %1509 = vmatmul.mubr.bf16.vlgmr.msra.gmra.mrb[4].mxu0 %v704_v29  ;;  %1591 = vmatmul.mubr.bf16.vlgmr.msra.gmra.mrb[4].mxu1 %v704_v29  ;;  %v3571_v29 = vld [vmem:[#allocation7 + $0x3e4] ss:$16 sps:$4 sm:$0xff]  }
 0x1ec   : > { %1518 = vmatpush1.bf16.msra.mxu0 %v3479_v27  ;;  %1600 = vmatpush1.bf16.msra.mxu1 %v3482_v28  ;;  %v3563_v27 = vld [vmem:[#allocation7 + $0x3c0] ss:$16 sps:$4 sm:$0xff]   ;;  %v3566_v28 = vld [vmem:[#allocation7 + $0x3c8] ss:$16 sps:$4 sm:$0xff]  }
 0x1ed   : > { %1549 = vmatprep.mubr.bf16.mxu0 %v707_v32  ;;  %1631 = vmatprep.mubr.bf16.mxu1 %v707_v32  ;;  %v3572_v32 = vld [vmem:[#allocation7 + $0x3e8] ss:$16 sps:$4 sm:$0xff]  }
 0x1ee   : > { %1519 = vmatprep.subr.bf16.mxu0 %v3487_v30  ;;  %1601 = vmatprep.subr.bf16.mxu1 %v3490_v31  ;;  %v3574_v30 = vld [vmem:[#allocation7 + $0x3ec] ss:$16 sps:$4 sm:$0xff]   ;;  %v3569_v31 = vld [vmem:[#allocation7 + $0x3e0] ss:$16 sps:$4 sm:$0xff]  }
 0x1f0   : > { %1520 = vmatpush1.bf16.msra.mxu0 %v3485_v33  ;;  %1602 = vmatpush1.bf16.msra.mxu1 %v3488_v34  ;;  %v702_v33 = vmax.f32 %v4373_v22, 0.0 }
 0x1f1   : > { %1521 = vmatprep.subr.bf16.mxu0 %v3493_v35  ;;  %1603 = vmatprep.subr.bf16.mxu1 %v3496_v36 }
 0x1f2   : > { %v706_v34 = vpack.c.bf16 %v702_v33, %v702_v33 }
 0x1f4   : > { %1522 = vmatpush1.bf16.msra.mxu0 %v3491_v37  ;;  %1604 = vmatpush1.bf16.msra.mxu1 %v3494_v38 }
 0x1f5   : > { %1523 = vmatprep.subr.bf16.mxu0 %v3499_v39  ;;  %1605 = vmatprep.subr.bf16.mxu1 %v3502_v40 }
 0x1f8   : > { %1524 = vmatpush1.bf16.msra.mxu0 %v3497_v41  ;;  %1606 = vmatpush1.bf16.msra.mxu1 %v3500_v42 }
 0x1f9   : > { %1525 = vmatprep.subr.bf16.mxu0 %v3505_v43  ;;  %1607 = vmatprep.subr.bf16.mxu1 %v3508_v45 }
 0x1fc   : > { %1526 = vmatpush1.bf16.msra.mxu0 %v3503_v46  ;;  %1608 = vmatpush1.bf16.msra.mxu1 %v3506_v47 }
 0x1fd   : > { %1527 = vmatprep.subr.bf16.mxu0 %v3511_v48  ;;  %1609 = vmatprep.subr.bf16.mxu1 %v3514_v49 }
 0x200   : > { %1528 = vmatpush1.bf16.msra.mxu0 %v3509_v50  ;;  %1610 = vmatpush1.bf16.msra.mxu1 %v3512_v51 }
 0x201   : > { %1529 = vmatprep.subr.bf16.mxu0 %v3517_v52  ;;  %1611 = vmatprep.subr.bf16.mxu1 %v3520_v54 }
 0x204   : > { %1530 = vmatpush1.bf16.msra.mxu0 %v3515_v58  ;;  %1612 = vmatpush1.bf16.msra.mxu1 %v3518_v59 }
 0x205   : > { %1531 = vmatprep.subr.bf16.mxu0 %v3523_v60  ;;  %1613 = vmatprep.subr.bf16.mxu1 %v3526_v61 }
 0x208   : > { %1532 = vmatpush1.bf16.msra.mxu0 %v3521_v62  ;;  %1614 = vmatpush1.bf16.msra.mxu1 %v3524_v63 }
 0x209   : > { %1533 = vmatprep.subr.bf16.mxu0 %v3529_v0  ;;  %1615 = vmatprep.subr.bf16.mxu1 %v3532_v1 }
 0x20c   : > { %1534 = vmatpush1.bf16.msra.mxu0 %v3527_v2  ;;  %1616 = vmatpush1.bf16.msra.mxu1 %v3530_v3 }
 0x20d   : > { %1535 = vmatprep.subr.bf16.mxu0 %v3535_v4  ;;  %1617 = vmatprep.subr.bf16.mxu1 %v3538_v5 }
 0x210   : > { %1536 = vmatpush1.bf16.msra.mxu0 %v3533_v7  ;;  %1618 = vmatpush1.bf16.msra.mxu1 %v3536_v9 }
 0x211   : > { %1537 = vmatprep.subr.bf16.mxu0 %v3541_v11  ;;  %1619 = vmatprep.subr.bf16.mxu1 %v3544_v15 }
 0x214   : > { %1538 = vmatpush1.bf16.msra.mxu0 %v3539_v16  ;;  %1620 = vmatpush1.bf16.msra.mxu1 %v3542_v17 }
 0x215   : > { %1539 = vmatprep.subr.bf16.mxu0 %v3547_v18  ;;  %1621 = vmatprep.subr.bf16.mxu1 %v3550_v8 }
 0x218   : > { %1540 = vmatpush1.bf16.msra.mxu0 %v3545_v12  ;;  %1622 = vmatpush1.bf16.msra.mxu1 %v3548_v20 }
 0x219   : > { %1541 = vmatprep.subr.bf16.mxu0 %v3553_v6  ;;  %1623 = vmatprep.subr.bf16.mxu1 %v3556_v19 }
 0x21c   : > { %1542 = vmatpush1.bf16.msra.mxu0 %v3551_v13  ;;  %1624 = vmatpush1.bf16.msra.mxu1 %v3554_v14 }
 0x21d   : > { %1543 = vmatprep.subr.bf16.mxu0 %v3559_v10  ;;  %1625 = vmatprep.subr.bf16.mxu1 %v3562_v21 }
 0x220   : > { %1544 = vmatpush1.bf16.msra.mxu0 %v3557_v23  ;;  %1626 = vmatpush1.bf16.msra.mxu1 %v3560_v24 }
 0x221   : > { %1545 = vmatprep.subr.bf16.mxu0 %v3565_v25  ;;  %1627 = vmatprep.subr.bf16.mxu1 %v3568_v26 }
 0x224   : > { %1546 = vmatpush1.bf16.msra.mxu0 %v3563_v27  ;;  %1628 = vmatpush1.bf16.msra.mxu1 %v3566_v28 }
 0x225   : > { %1547 = vmatprep.subr.bf16.mxu0 %v3571_v29  ;;  %1629 = vmatprep.subr.bf16.mxu1 %v3574_v30 }
 0x228   : > { %1548 = vmatpush1.bf16.msra.mxu0 %v3569_v31  ;;  %1630 = vmatpush1.bf16.msra.mxu1 %v3572_v32 }
 0x22b   : > { %1550 = vmatmul.mubr.bf16.vlgmr.msra.gmra.mrb[4].mxu0 %v706_v34  ;;  %1632 = vmatmul.mubr.bf16.vlgmr.msra.gmra.mrb[4].mxu1 %v706_v34 }
 0x2fe   : > { %v4376_v35 = vpop.f32.mrb[4].mxu0  ;;  %v4378_v36 = vpop.f32.mrb[4].mxu1 }
 0x2ff   : > { %v1644_v37 = vrot.slane %v4376_v35, 4  ;;  %v1668_v38 = vmul.f32 %v4376_v35, %v4376_v35  ;;  %v1656_v39 = vrot.slane %v4378_v36, 4  ;;  %v1670_v40 = vmul.f32 %v4378_v36, %v4378_v36  ;;  %v4386_v22 = vpop.f32.mrb[5].mxu0  ;;  %v4388_v41 = vpop.f32.mrb[5].mxu1 }
 0x300   : > { %v1650_v42 = vrot.slane %v4386_v22, 4  ;;  %v1669_v43 = vmul.f32 %v4386_v22, %v4386_v22  ;;  %v1662_v45 = vrot.slane %v4388_v41, 4  ;;  %v1671_v46 = vmul.f32 %v4388_v41, %v4388_v41  ;;  %v1555_v47 = vpop.f32.mrb[6].mxu0  ;;  %v1637_v48 = vpop.f32.mrb[6].mxu1 }
 0x301   : > { %v1645_v49 = vadd.f32 %v1644_v37, %v4376_v35  ;;  %v1672_v50 = vrot.slane %v1668_v38, 4  ;;  %v1657_v51 = vadd.f32 %v1656_v39, %v4378_v36  ;;  %v1684_v52 = vrot.slane %v1670_v40, 4  ;;  %v1556_v54 = vpop.f32.mrb[7].mxu0  ;;  %v1638_v58 = vpop.f32.mrb[7].mxu1 }
 0x302   : > { %v1651_v59 = vadd.f32 %v1650_v42, %v4386_v22  ;;  %v1678_v60 = vrot.slane %v1669_v43, 4  ;;  %v1663_v61 = vadd.f32 %v1662_v45, %v4388_v41  ;;  %v1690_v62 = vrot.slane %v1671_v46, 4 }
 0x303   : > { %v1646_v63 = vrot.slane %v1645_v49, 2  ;;  %v1673_v0 = vadd.f32 %v1672_v50, %v1668_v38  ;;  %v1658_v1 = vrot.slane %v1657_v51, 2  ;;  %v1685_v2 = vadd.f32 %v1684_v52, %v1670_v40 }
 0x304   : > { %v1652_v3 = vrot.slane %v1651_v59, 2  ;;  %v1679_v4 = vadd.f32 %v1678_v60, %v1669_v43  ;;  %v1664_v5 = vrot.slane %v1663_v61, 2  ;;  %v1691_v7 = vadd.f32 %v1690_v62, %v1671_v46 }
 0x305   : > { %v1647_v9 = vadd.f32 %v1646_v63, %v1645_v49  ;;  %v1674_v11 = vrot.slane %v1673_v0, 2  ;;  %v1659_v15 = vadd.f32 %v1658_v1, %v1657_v51  ;;  %v1686_v16 = vrot.slane %v1685_v2, 2 }
 0x306   : > { %v1653_v17 = vadd.f32 %v1652_v3, %v1651_v59  ;;  %v1680_v18 = vrot.slane %v1679_v4, 2  ;;  %v1665_v8 = vadd.f32 %v1664_v5, %v1663_v61  ;;  %v1692_v12 = vrot.slane %v1691_v7, 2 }
 0x307   : > { %v1648_v20 = vrot.slane %v1647_v9, 1  ;;  %v1675_v6 = vadd.f32 %v1674_v11, %v1673_v0  ;;  %v1660_v19 = vrot.slane %v1659_v15, 1  ;;  %v1687_v13 = vadd.f32 %v1686_v16, %v1685_v2 }
 0x308   : > { %v1654_v14 = vrot.slane %v1653_v17, 1  ;;  %v1681_v10 = vadd.f32 %v1680_v18, %v1679_v4  ;;  %v1666_v21 = vrot.slane %v1665_v8, 1  ;;  %v1693_v23 = vadd.f32 %v1692_v12, %v1691_v7 }
 0x309   : > { %v1649_v24 = vadd.f32 %v1648_v20, %v1647_v9  ;;  %v1676_v25 = vrot.slane %v1675_v6, 1  ;;  %v1661_v26 = vadd.f32 %v1660_v19, %v1659_v15  ;;  %v1688_v27 = vrot.slane %v1687_v13, 1 }
 0x30a   : > { %v1655_v28 = vadd.f32 %v1654_v14, %v1653_v17  ;;  %v1682_v29 = vrot.slane %v1681_v10, 1  ;;  %v1667_v30 = vadd.f32 %v1666_v21, %v1665_v8  ;;  %v1694_v31 = vrot.slane %v1693_v23, 1  ;;  %v1641_v8 = vld [vmem:[#allocation8 + $0x2] ss:$8 sm:$0xf] }
 0x30b   : > { %v1677_v32 = vadd.f32 %v1676_v25, %v1675_v6  ;;  %v1696_v33 = vmul.f32 0.125, %v1649_v24  ;;  %v1689_v34 = vadd.f32 %v1688_v27, %v1687_v13  ;;  %v1698_v37 = vmul.f32 0.125, %v1661_v26 }
 0x30c   : > { %v1683_v38 = vadd.f32 %v1682_v29, %v1681_v10  ;;  %v1697_v39 = vmul.f32 0.125, %v1655_v28  ;;  %v1695_v40 = vadd.f32 %v1694_v31, %v1693_v23  ;;  %v1699_v42 = vmul.f32 0.125, %v1667_v30 }
 0x30d   : > { %v1700_v43 = vmul.f32 0.125, %v1677_v32  ;;  %v1704_v45 = vmul.f32 %v1696_v33, %v1696_v33  ;;  %v1702_v46 = vmul.f32 0.125, %v1689_v34  ;;  %v1706_v47 = vmul.f32 %v1698_v37, %v1698_v37 }
 0x30e   : > { %v1701_v48 = vmul.f32 0.125, %v1683_v38  ;;  %v1705_v49 = vmul.f32 %v1697_v39, %v1697_v39  ;;  %v1703_v50 = vmul.f32 0.125, %v1695_v40  ;;  %v1707_v51 = vmul.f32 %v1699_v42, %v1699_v42  ;;  %v1643_v38 = vld [vmem:[#allocation8 + $0x3] ss:$8 sm:$0xf] }
 0x30f   : > { %v1708_v52 = vsub.f32 %v1700_v43, %v1704_v45  ;;  %v1710_v54 = vsub.f32 %v1702_v46, %v1706_v47 }
 0x310   : > { %v1709_v58 = vsub.f32 %v1701_v48, %v1705_v49  ;;  %v1711_v59 = vsub.f32 %v1703_v50, %v1707_v51 }
 0x311   : > { %v1712_v60 = vmax.f32 %v1708_v52, 0.0  ;;  %v1714_v61 = vmax.f32 %v1710_v54, 0.0 }
 0x312   : > { %v1713_v62 = vmax.f32 %v1709_v58, 0.0  ;;  %v1715_v63 = vmax.f32 %v1711_v59, 0.0 }
 0x313   : > { %v1716_v0 = vadd.f32 1e-05, %v1712_v60  ;;  %v1718_v1 = vadd.f32 1e-05, %v1714_v61 }
 0x314   : > { %v1717_v2 = vadd.f32 1e-05, %v1713_v62  ;;  %v1719_v3 = vadd.f32 1e-05, %v1715_v63 }
 0x315   : > { %3583 = vrsqrt.f32 %v1716_v0 }
 0x316   : > { %3585 = vrsqrt.f32 %v1718_v1 }
 0x317   : > { %3587 = vrsqrt.f32 %v1717_v2 }
 0x318   : > { %3589 = vrsqrt.f32 %v1719_v3 }
 0x31f   : > { %v3584_v4 = vpop.eup %3583 }
 0x320   : > { %v3586_v5 = vpop.eup %3585 }
 0x321   : > { %v3588_v7 = vpop.eup %3587 }
 0x322   : > { %v3590_v9 = vpop.eup %3589  ;;  %v1728_v11 = vcombine.low %v3584_v4, %v3588_v7 }
 0x323   : > { %v1729_v15 = vcombine.low %v3586_v5, %v3590_v9 }
 0x324   : > { %v1736_v16 = vrot.slane %v1728_v11, %v4345_v44 }
 0x325   : > { %v1743_v17 = vrot.slane %v1729_v15, %v4345_v44 }
 0x327   : > { %v1744_v18 = vcombine.low %v1736_v16, %v1743_v17 }
 0x329   : > { %v1751_v12 = vrot.slane %v1744_v18, %v4345_v44 }
 0x32b   : > { %v1753_v20 = vmul.f32 %v1751_v12, %v1641_v8 }
 0x32d   : > { %v1758_v6 = vrot.slane %v1753_v20, %v4354_v56  ;;  %v1762_v19 = vrot.slane %v1753_v20, %v4356_v57  ;;  %v1766_v13 = vrot.slane %v1753_v20, %v4349_v53  ;;  %v1770_v14 = vrot.slane %v1753_v20, %v4352_v55 }
 0x32f   : > { %v1775_v10 = vmul.f32 %v1758_v6, %v1696_v33  ;;  %v1776_v21 = vmul.f32 %v1762_v19, %v1697_v39  ;;  %v1777_v23 = vmul.f32 %v1766_v13, %v1698_v37  ;;  %v1778_v24 = vmul.f32 %v1770_v14, %v1699_v42 }
 0x330   : > { %v1809_v25 = vmul.f32 %v1758_v6, %v4376_v35  ;;  %v1810_v26 = vmul.f32 %v1762_v19, %v4386_v22  ;;  %v1811_v27 = vmul.f32 %v1766_v13, %v4378_v36  ;;  %v1812_v28 = vmul.f32 %v1770_v14, %v4388_v41 }
 0x331   : > { %v1783_v29 = vcombine.low %v1775_v10, %v1776_v21  ;;  %v1784_v30 = vcombine.low %v1777_v23, %v1778_v24 }
 0x333   : > { %v1791_v31 = vrot.slane %v1783_v29, %v4345_v44  ;;  %v1798_v32 = vrot.slane %v1784_v30, %v4345_v44 }
 0x335   : > { %v1799_v34 = vcombine.low %v1791_v31, %v1798_v32 }
 0x337   : > { %v1806_v33 = vrot.slane %v1799_v34, %v4345_v44 }
 0x339   : > { %v1808_v37 = vsub.f32 %v1643_v38, %v1806_v33 }
 0x33b   : > { %v1817_v39 = vrot.slane %v1808_v37, %v4354_v56  ;;  %v1821_v35 = vrot.slane %v1808_v37, %v4356_v57  ;;  %v1825_v22 = vrot.slane %v1808_v37, %v4349_v53  ;;  %v1829_v36 = vrot.slane %v1808_v37, %v4352_v55 }
 0x33d   : > { %v1834_v41 = vadd.f32 %v1817_v39, %v1809_v25  ;;  %v1835_v40 = vadd.f32 %v1821_v35, %v1810_v26  ;;  %v1836_v42 = vadd.f32 %v1825_v22, %v1811_v27  ;;  %v1837_v43 = vadd.f32 %v1829_v36, %v1812_v28 }
 0x33f   : > { %v1838_v45 = vmax.f32 %v1834_v41, 0.0  ;;  %v1839_v46 = vmax.f32 %v1835_v40, 0.0  ;;  %v1840_v47 = vmax.f32 %v1836_v42, 0.0  ;;  %v1841_v48 = vmax.f32 %v1837_v43, 0.0 }
 0x341   : > { %v3259_v49 = vpack.c.bf16 %v1839_v46, %v1838_v45  ;;  %v3260_v50 = vpack.c.bf16 %v1841_v48, %v1840_v47 }
 0x343   : > { %1858 = vst [vmem:[#allocation2] sm:$0xff] %v3259_v49  ;;  %1859 = vst [vmem:[#allocation2 + $0x8] sm:$0xff] %v3260_v50 }
 0x344 PF: > { %v3591_v44 = vld [vmem:[%s4304_s20 + $0x4] ss:$16 sps:$4 sm:$0xff]   ;;  %v3593_v53 = vld [vmem:[%s4304_s20 + $0xc] ss:$16 sps:$4 sm:$0xff]   ;;  %v3595_v55 = vld [vmem:[%s4304_s20] ss:$16 sps:$4 sm:$0xff]  }
 0x345   : > { %2666 = vmatprep.subr.bf16.mxu0 %v3591_v44  ;;  %v3596_v56 = vld [vmem:[%s4304_s20 + $0x8] ss:$16 sps:$4 sm:$0xff]   ;;  %2748 = vmatprep.subr.bf16.mxu1 %v3593_v53  ;;  %v3597_v57 = vld [vmem:[%s4304_s20 + $0x24] ss:$16 sps:$4 sm:$0xff]   ;;  %v3599_v51 = vld [vmem:[%s4304_s20 + $0x2c] ss:$16 sps:$4 sm:$0xff]  }
 0x346   : > { %2667 = vmatpush1.bf16.msra.mxu0 %v3595_v55  ;;  %2749 = vmatpush1.bf16.msra.mxu1 %v3596_v56  ;;  %v3601_v52 = vld [vmem:[%s4304_s20 + $0x20] ss:$16 sps:$4 sm:$0xff]   ;;  %v3602_v54 = vld [vmem:[%s4304_s20 + $0x28] ss:$16 sps:$4 sm:$0xff]   ;;  %v3603_v58 = vld [vmem:[%s4304_s20 + $0x44] ss:$16 sps:$4 sm:$0xff]  }
 0x347   : > { %2668 = vmatprep.subr.bf16.mxu0 %v3597_v57  ;;  %2750 = vmatprep.subr.bf16.mxu1 %v3599_v51  ;;  %v3605_v59 = vld [vmem:[%s4304_s20 + $0x4c] ss:$16 sps:$4 sm:$0xff]   ;;  %v3607_v60 = vld [vmem:[%s4304_s20 + $0x40] ss:$16 sps:$4 sm:$0xff]   ;;  %v3608_v61 = vld [vmem:[%s4304_s20 + $0x48] ss:$16 sps:$4 sm:$0xff]  }
 0x348   : > { %v3609_v62 = vld [vmem:[%s4304_s20 + $0x64] ss:$16 sps:$4 sm:$0xff]   ;;  %v3611_v63 = vld [vmem:[%s4304_s20 + $0x6c] ss:$16 sps:$4 sm:$0xff]   ;;  %v3613_v0 = vld [vmem:[%s4304_s20 + $0x60] ss:$16 sps:$4 sm:$0xff]  }
 0x349   : > { %v3614_v1 = vld [vmem:[%s4304_s20 + $0x68] ss:$16 sps:$4 sm:$0xff]   ;;  %v3615_v2 = vld [vmem:[%s4304_s20 + $0x84] ss:$16 sps:$4 sm:$0xff]   ;;  %v3617_v3 = vld [vmem:[%s4304_s20 + $0x8c] ss:$16 sps:$4 sm:$0xff]  }
 0x34a   : > { %2669 = vmatpush1.bf16.msra.mxu0 %v3601_v52  ;;  %2751 = vmatpush1.bf16.msra.mxu1 %v3602_v54  ;;  %v3619_v4 = vld [vmem:[%s4304_s20 + $0x80] ss:$16 sps:$4 sm:$0xff]   ;;  %v3620_v5 = vld [vmem:[%s4304_s20 + $0x88] ss:$16 sps:$4 sm:$0xff]   ;;  %v3621_v7 = vld [vmem:[%s4304_s20 + $0xa4] ss:$16 sps:$4 sm:$0xff]  }
 0x34b   : > { %2670 = vmatprep.subr.bf16.mxu0 %v3603_v58  ;;  %2752 = vmatprep.subr.bf16.mxu1 %v3605_v59  ;;  %v3623_v9 = vld [vmem:[%s4304_s20 + $0xac] ss:$16 sps:$4 sm:$0xff]   ;;  %v3625_v11 = vld [vmem:[%s4304_s20 + $0xa0] ss:$16 sps:$4 sm:$0xff]   ;;  %v3626_v15 = vld [vmem:[%s4304_s20 + $0xa8] ss:$16 sps:$4 sm:$0xff]  }
 0x34c   : > { %v3627_v16 = vld [vmem:[%s4304_s20 + $0xc4] ss:$16 sps:$4 sm:$0xff]   ;;  %v3629_v17 = vld [vmem:[%s4304_s20 + $0xcc] ss:$16 sps:$4 sm:$0xff]   ;;  %v3631_v18 = vld [vmem:[%s4304_s20 + $0xc0] ss:$16 sps:$4 sm:$0xff]  }
 0x34d   : > { %v3632_v8 = vld [vmem:[%s4304_s20 + $0xc8] ss:$16 sps:$4 sm:$0xff]   ;;  %v3633_v12 = vld [vmem:[%s4304_s20 + $0xe4] ss:$16 sps:$4 sm:$0xff]   ;;  %v3635_v20 = vld [vmem:[%s4304_s20 + $0xec] ss:$16 sps:$4 sm:$0xff]  }
 0x34e   : > { %2671 = vmatpush1.bf16.msra.mxu0 %v3607_v60  ;;  %2753 = vmatpush1.bf16.msra.mxu1 %v3608_v61  ;;  %v3637_v6 = vld [vmem:[%s4304_s20 + $0xe0] ss:$16 sps:$4 sm:$0xff]   ;;  %v3638_v19 = vld [vmem:[%s4304_s20 + $0xe8] ss:$16 sps:$4 sm:$0xff]   ;;  %v3639_v13 = vld [vmem:[%s4304_s20 + $0x104] ss:$16 sps:$4 sm:$0xff]  }
 0x34f   : > { %2672 = vmatprep.subr.bf16.mxu0 %v3609_v62  ;;  %2754 = vmatprep.subr.bf16.mxu1 %v3611_v63  ;;  %v3641_v14 = vld [vmem:[%s4304_s20 + $0x10c] ss:$16 sps:$4 sm:$0xff]   ;;  %v3643_v10 = vld [vmem:[%s4304_s20 + $0x100] ss:$16 sps:$4 sm:$0xff]   ;;  %v3644_v21 = vld [vmem:[%s4304_s20 + $0x108] ss:$16 sps:$4 sm:$0xff]  }
 0x350   : > { %v3645_v23 = vld [vmem:[%s4304_s20 + $0x124] ss:$16 sps:$4 sm:$0xff]   ;;  %v3647_v24 = vld [vmem:[%s4304_s20 + $0x12c] ss:$16 sps:$4 sm:$0xff]   ;;  %v3649_v25 = vld [vmem:[%s4304_s20 + $0x120] ss:$16 sps:$4 sm:$0xff]  }
 0x351   : > { %v3650_v26 = vld [vmem:[%s4304_s20 + $0x128] ss:$16 sps:$4 sm:$0xff]   ;;  %v3651_v27 = vld [vmem:[%s4304_s20 + $0x144] ss:$16 sps:$4 sm:$0xff]   ;;  %v3653_v28 = vld [vmem:[%s4304_s20 + $0x14c] ss:$16 sps:$4 sm:$0xff]  }
 0x352   : > { %2673 = vmatpush1.bf16.msra.mxu0 %v3613_v0  ;;  %2755 = vmatpush1.bf16.msra.mxu1 %v3614_v1  ;;  %v3655_v29 = vld [vmem:[%s4304_s20 + $0x140] ss:$16 sps:$4 sm:$0xff]   ;;  %v3656_v30 = vld [vmem:[%s4304_s20 + $0x148] ss:$16 sps:$4 sm:$0xff]   ;;  %v3657_v31 = vld [vmem:[%s4304_s20 + $0x164] ss:$16 sps:$4 sm:$0xff]  }
 0x353   : > { %2674 = vmatprep.subr.bf16.mxu0 %v3615_v2  ;;  %2756 = vmatprep.subr.bf16.mxu1 %v3617_v3  ;;  %v3659_v32 = vld [vmem:[%s4304_s20 + $0x16c] ss:$16 sps:$4 sm:$0xff]   ;;  %v3661_v38 = vld [vmem:[%s4304_s20 + $0x160] ss:$16 sps:$4 sm:$0xff]   ;;  %v3662_v37 = vld [vmem:[%s4304_s20 + $0x168] ss:$16 sps:$4 sm:$0xff]  }
 0x354   : > { %v1860_v34 = vld [vmem:[#allocation2] sm:$0xff]  ;;  %v3663_v39 = vld [vmem:[%s4304_s20 + $0x184] ss:$16 sps:$4 sm:$0xff]   ;;  %v3667_v22 = vld [vmem:[%s4304_s20 + $0x180] ss:$16 sps:$4 sm:$0xff]  }
 0x355   : > { %v3124_v33 = vcombine.high %v1860_v34, %v1860_v34  ;;  %v3665_v35 = vld [vmem:[%s4304_s20 + $0x18c] ss:$16 sps:$4 sm:$0xff]   ;;  %v3668_v36 = vld [vmem:[%s4304_s20 + $0x188] ss:$16 sps:$4 sm:$0xff]   ;;  %v3669_v41 = vld [vmem:[%s4304_s20 + $0x1a4] ss:$16 sps:$4 sm:$0xff]   ;;  %v3123_v57 = vcombine.low %v1860_v34, %v1860_v34 }
 0x356   : > { %2675 = vmatpush1.bf16.msra.mxu0 %v3619_v4  ;;  %2757 = vmatpush1.bf16.msra.mxu1 %v3620_v5  ;;  %v3671_v40 = vld [vmem:[%s4304_s20 + $0x1ac] ss:$16 sps:$4 sm:$0xff]   ;;  %v3673_v42 = vld [vmem:[%s4304_s20 + $0x1a0] ss:$16 sps:$4 sm:$0xff]   ;;  %v3674_v43 = vld [vmem:[%s4304_s20 + $0x1a8] ss:$16 sps:$4 sm:$0xff]  }
 0x357   : > { %2676 = vmatprep.subr.bf16.mxu0 %v3621_v7  ;;  %2758 = vmatprep.subr.bf16.mxu1 %v3623_v9  ;;  %v3675_v45 = vld [vmem:[%s4304_s20 + $0x1c4] ss:$16 sps:$4 sm:$0xff]   ;;  %v3677_v46 = vld [vmem:[%s4304_s20 + $0x1cc] ss:$16 sps:$4 sm:$0xff]   ;;  %v3679_v47 = vld [vmem:[%s4304_s20 + $0x1c0] ss:$16 sps:$4 sm:$0xff]  }
 0x358   : > { %2698 = vmatprep.mubr.bf16.mxu0 %v3124_v33  ;;  %2780 = vmatprep.mubr.bf16.mxu1 %v3124_v33  ;;  %v3680_v48 = vld [vmem:[%s4304_s20 + $0x1c8] ss:$16 sps:$4 sm:$0xff]   ;;  %v3681_v49 = vld [vmem:[%s4304_s20 + $0x1e4] ss:$16 sps:$4 sm:$0xff]   ;;  %v3683_v50 = vld [vmem:[%s4304_s20 + $0x1ec] ss:$16 sps:$4 sm:$0xff]  }
 0x359   : > { %v3685_v44 = vld [vmem:[%s4304_s20 + $0x1e0] ss:$16 sps:$4 sm:$0xff]   ;;  %v3686_v53 = vld [vmem:[%s4304_s20 + $0x1e8] ss:$16 sps:$4 sm:$0xff]   ;;  %v3691_v55 = vld [vmem:[%s4304_s20 + $0x204] ss:$16 sps:$4 sm:$0xff]  }
 0x35a   : > { %2677 = vmatpush1.bf16.msra.mxu0 %v3625_v11  ;;  %2759 = vmatpush1.bf16.msra.mxu1 %v3626_v15  ;;  %v3694_v56 = vld [vmem:[%s4304_s20 + $0x20c] ss:$16 sps:$4 sm:$0xff]   ;;  %v3689_v51 = vld [vmem:[%s4304_s20 + $0x200] ss:$16 sps:$4 sm:$0xff]   ;;  %v3692_v52 = vld [vmem:[%s4304_s20 + $0x208] ss:$16 sps:$4 sm:$0xff]  }
 0x35b   : > { %2678 = vmatprep.subr.bf16.mxu0 %v3627_v16  ;;  %2760 = vmatprep.subr.bf16.mxu1 %v3629_v17  ;;  %v3697_v54 = vld [vmem:[%s4304_s20 + $0x224] ss:$16 sps:$4 sm:$0xff]   ;;  %v3700_v58 = vld [vmem:[%s4304_s20 + $0x22c] ss:$16 sps:$4 sm:$0xff]   ;;  %v3695_v59 = vld [vmem:[%s4304_s20 + $0x220] ss:$16 sps:$4 sm:$0xff]  }
 0x35c   : > { %v3698_v60 = vld [vmem:[%s4304_s20 + $0x228] ss:$16 sps:$4 sm:$0xff]   ;;  %v3703_v61 = vld [vmem:[%s4304_s20 + $0x244] ss:$16 sps:$4 sm:$0xff]   ;;  %v3706_v62 = vld [vmem:[%s4304_s20 + $0x24c] ss:$16 sps:$4 sm:$0xff]  }
 0x35d   : > { %v3701_v63 = vld [vmem:[%s4304_s20 + $0x240] ss:$16 sps:$4 sm:$0xff]   ;;  %v3704_v0 = vld [vmem:[%s4304_s20 + $0x248] ss:$16 sps:$4 sm:$0xff]   ;;  %v3709_v1 = vld [vmem:[%s4304_s20 + $0x264] ss:$16 sps:$4 sm:$0xff]  }
 0x35e   : > { %2679 = vmatpush1.bf16.msra.mxu0 %v3631_v18  ;;  %2761 = vmatpush1.bf16.msra.mxu1 %v3632_v8  ;;  %v3712_v2 = vld [vmem:[%s4304_s20 + $0x26c] ss:$16 sps:$4 sm:$0xff]   ;;  %v3707_v3 = vld [vmem:[%s4304_s20 + $0x260] ss:$16 sps:$4 sm:$0xff]   ;;  %v3710_v4 = vld [vmem:[%s4304_s20 + $0x268] ss:$16 sps:$4 sm:$0xff]  }
 0x35f   : > { %2680 = vmatprep.subr.bf16.mxu0 %v3633_v12  ;;  %2762 = vmatprep.subr.bf16.mxu1 %v3635_v20  ;;  %v3715_v5 = vld [vmem:[%s4304_s20 + $0x284] ss:$16 sps:$4 sm:$0xff]   ;;  %v3718_v7 = vld [vmem:[%s4304_s20 + $0x28c] ss:$16 sps:$4 sm:$0xff]   ;;  %v3713_v9 = vld [vmem:[%s4304_s20 + $0x280] ss:$16 sps:$4 sm:$0xff]  }
 0x360   : > { %v3716_v11 = vld [vmem:[%s4304_s20 + $0x288] ss:$16 sps:$4 sm:$0xff]   ;;  %v3721_v15 = vld [vmem:[%s4304_s20 + $0x2a4] ss:$16 sps:$4 sm:$0xff]   ;;  %v3724_v16 = vld [vmem:[%s4304_s20 + $0x2ac] ss:$16 sps:$4 sm:$0xff]  }
 0x361   : > { %v3719_v17 = vld [vmem:[%s4304_s20 + $0x2a0] ss:$16 sps:$4 sm:$0xff]   ;;  %v3722_v18 = vld [vmem:[%s4304_s20 + $0x2a8] ss:$16 sps:$4 sm:$0xff]   ;;  %v3727_v8 = vld [vmem:[%s4304_s20 + $0x2c4] ss:$16 sps:$4 sm:$0xff]  }
 0x362   : > { %2681 = vmatpush1.bf16.msra.mxu0 %v3637_v6  ;;  %2763 = vmatpush1.bf16.msra.mxu1 %v3638_v19  ;;  %v3730_v12 = vld [vmem:[%s4304_s20 + $0x2cc] ss:$16 sps:$4 sm:$0xff]   ;;  %v4508_v20 = vld [vmem:[#allocation2 + $0x8] sm:$0xff]  ;;  %v3752_v33 = vld [vmem:[%s4304_s20 + $0x348] ss:$16 sps:$4 sm:$0xff]  }
 0x363   : > { %2682 = vmatprep.subr.bf16.mxu0 %v3639_v13  ;;  %2764 = vmatprep.subr.bf16.mxu1 %v3641_v14  ;;  %v3126_v6 = vcombine.high %v4508_v20, %v4508_v20  ;;  %v3725_v19 = vld [vmem:[%s4304_s20 + $0x2c0] ss:$16 sps:$4 sm:$0xff]   ;;  %v3728_v13 = vld [vmem:[%s4304_s20 + $0x2c8] ss:$16 sps:$4 sm:$0xff]   ;;  %v3733_v14 = vld [vmem:[%s4304_s20 + $0x2e4] ss:$16 sps:$4 sm:$0xff]  }
 0x364   : > { %v3754_v34 = vld [vmem:[%s4304_s20 + $0x34c] ss:$16 sps:$4 sm:$0xff]  }
 0x366   : > { %2683 = vmatpush1.bf16.msra.mxu0 %v3643_v10  ;;  %2765 = vmatpush1.bf16.msra.mxu1 %v3644_v21  ;;  %v3736_v10 = vld [vmem:[%s4304_s20 + $0x2ec] ss:$16 sps:$4 sm:$0xff]   ;;  %v3731_v21 = vld [vmem:[%s4304_s20 + $0x2e0] ss:$16 sps:$4 sm:$0xff]  }
 0x367   : > { %2684 = vmatprep.subr.bf16.mxu0 %v3645_v23  ;;  %2766 = vmatprep.subr.bf16.mxu1 %v3647_v24  ;;  %v3734_v23 = vld [vmem:[%s4304_s20 + $0x2e8] ss:$16 sps:$4 sm:$0xff]   ;;  %v3739_v24 = vld [vmem:[%s4304_s20 + $0x304] ss:$16 sps:$4 sm:$0xff]  }
 0x36a   : > { %2685 = vmatpush1.bf16.msra.mxu0 %v3649_v25  ;;  %2767 = vmatpush1.bf16.msra.mxu1 %v3650_v26  ;;  %v3742_v25 = vld [vmem:[%s4304_s20 + $0x30c] ss:$16 sps:$4 sm:$0xff]   ;;  %v3737_v26 = vld [vmem:[%s4304_s20 + $0x300] ss:$16 sps:$4 sm:$0xff]  }
 0x36b   : > { %2686 = vmatprep.subr.bf16.mxu0 %v3651_v27  ;;  %2768 = vmatprep.subr.bf16.mxu1 %v3653_v28  ;;  %v3740_v27 = vld [vmem:[%s4304_s20 + $0x308] ss:$16 sps:$4 sm:$0xff]   ;;  %v3745_v28 = vld [vmem:[%s4304_s20 + $0x324] ss:$16 sps:$4 sm:$0xff]  }
 0x36e   : > { %2687 = vmatpush1.bf16.msra.mxu0 %v3655_v29  ;;  %2769 = vmatpush1.bf16.msra.mxu1 %v3656_v30  ;;  %v3748_v29 = vld [vmem:[%s4304_s20 + $0x32c] ss:$16 sps:$4 sm:$0xff]   ;;  %v3743_v30 = vld [vmem:[%s4304_s20 + $0x320] ss:$16 sps:$4 sm:$0xff]  }
 0x36f   : > { %2688 = vmatprep.subr.bf16.mxu0 %v3657_v31  ;;  %2770 = vmatprep.subr.bf16.mxu1 %v3659_v32  ;;  %v3746_v31 = vld [vmem:[%s4304_s20 + $0x328] ss:$16 sps:$4 sm:$0xff]   ;;  %v3751_v32 = vld [vmem:[%s4304_s20 + $0x344] ss:$16 sps:$4 sm:$0xff]  }
 0x372   : > { %2689 = vmatpush1.bf16.msra.mxu0 %v3661_v38  ;;  %2771 = vmatpush1.bf16.msra.mxu1 %v3662_v37  ;;  %v3749_v38 = vld [vmem:[%s4304_s20 + $0x340] ss:$16 sps:$4 sm:$0xff]   ;;  %v3757_v37 = vld [vmem:[%s4304_s20 + $0x364] ss:$16 sps:$4 sm:$0xff]  }
 0x373   : > { %2690 = vmatprep.subr.bf16.mxu0 %v3663_v39  ;;  %2772 = vmatprep.subr.bf16.mxu1 %v3665_v35  ;;  %v3760_v39 = vld [vmem:[%s4304_s20 + $0x36c] ss:$16 sps:$4 sm:$0xff]   ;;  %v3755_v35 = vld [vmem:[%s4304_s20 + $0x360] ss:$16 sps:$4 sm:$0xff]  }
 0x376   : > { %2691 = vmatpush1.bf16.msra.mxu0 %v3667_v22  ;;  %2773 = vmatpush1.bf16.msra.mxu1 %v3668_v36  ;;  %v3758_v22 = vld [vmem:[%s4304_s20 + $0x368] ss:$16 sps:$4 sm:$0xff]   ;;  %v3763_v36 = vld [vmem:[%s4304_s20 + $0x384] ss:$16 sps:$4 sm:$0xff]  }
 0x377   : > { %2692 = vmatprep.subr.bf16.mxu0 %v3669_v41  ;;  %2774 = vmatprep.subr.bf16.mxu1 %v3671_v40  ;;  %v3766_v41 = vld [vmem:[%s4304_s20 + $0x38c] ss:$16 sps:$4 sm:$0xff]   ;;  %v3761_v40 = vld [vmem:[%s4304_s20 + $0x380] ss:$16 sps:$4 sm:$0xff]  }
 0x37a   : > { %2693 = vmatpush1.bf16.msra.mxu0 %v3673_v42  ;;  %2775 = vmatpush1.bf16.msra.mxu1 %v3674_v43  ;;  %v3764_v42 = vld [vmem:[%s4304_s20 + $0x388] ss:$16 sps:$4 sm:$0xff]   ;;  %v3769_v43 = vld [vmem:[%s4304_s20 + $0x3a4] ss:$16 sps:$4 sm:$0xff]  }
 0x37b   : > { %2694 = vmatprep.subr.bf16.mxu0 %v3675_v45  ;;  %2776 = vmatprep.subr.bf16.mxu1 %v3677_v46  ;;  %v3772_v45 = vld [vmem:[%s4304_s20 + $0x3ac] ss:$16 sps:$4 sm:$0xff]   ;;  %v3767_v46 = vld [vmem:[%s4304_s20 + $0x3a0] ss:$16 sps:$4 sm:$0xff]  }
 0x37e   : > { %2695 = vmatpush1.bf16.msra.mxu0 %v3679_v47  ;;  %2777 = vmatpush1.bf16.msra.mxu1 %v3680_v48  ;;  %v3770_v47 = vld [vmem:[%s4304_s20 + $0x3a8] ss:$16 sps:$4 sm:$0xff]   ;;  %v3775_v48 = vld [vmem:[%s4304_s20 + $0x3c4] ss:$16 sps:$4 sm:$0xff]  }
 0x37f   : > { %2696 = vmatprep.subr.bf16.mxu0 %v3681_v49  ;;  %2778 = vmatprep.subr.bf16.mxu1 %v3683_v50  ;;  %v3778_v49 = vld [vmem:[%s4304_s20 + $0x3cc] ss:$16 sps:$4 sm:$0xff]   ;;  %v3773_v50 = vld [vmem:[%s4304_s20 + $0x3c0] ss:$16 sps:$4 sm:$0xff]  }
 0x382   : > { %2697 = vmatpush1.bf16.msra.mxu0 %v3685_v44  ;;  %2779 = vmatpush1.bf16.msra.mxu1 %v3686_v53  ;;  %v3776_v44 = vld [vmem:[%s4304_s20 + $0x3c8] ss:$16 sps:$4 sm:$0xff]   ;;  %v3781_v53 = vld [vmem:[%s4304_s20 + $0x3e4] ss:$16 sps:$4 sm:$0xff]  }
 0x383   : > { %2707 = vmatprep.subr.bf16.mxu0 %v3691_v55  ;;  %2789 = vmatprep.subr.bf16.mxu1 %v3694_v56  ;;  %v3784_v55 = vld [vmem:[%s4304_s20 + $0x3ec] ss:$16 sps:$4 sm:$0xff]   ;;  %v3779_v56 = vld [vmem:[%s4304_s20 + $0x3e0] ss:$16 sps:$4 sm:$0xff]  }
 0x385   : > { %2699 = vmatmul.mubr.bf16.vlgmr.msra.gmra.mrb[0].mxu0 %v3123_v57  ;;  %2781 = vmatmul.mubr.bf16.vlgmr.msra.gmra.mrb[0].mxu1 %v3123_v57  ;;  %v3782_v57 = vld [vmem:[%s4304_s20 + $0x3e8] ss:$16 sps:$4 sm:$0xff]  }
 0x386   : > { %2708 = vmatpush1.bf16.msra.mxu0 %v3689_v51  ;;  %2790 = vmatpush1.bf16.msra.mxu1 %v3692_v52  ;;  %v3125_v51 = vcombine.low %v4508_v20, %v4508_v20  ;;  %v1992_v52 = vlaneseq }
 0x387   : > { %2709 = vmatprep.subr.bf16.mxu0 %v3697_v54  ;;  %2791 = vmatprep.subr.bf16.mxu1 %v3700_v58 }
 0x388   : > { %2739 = vmatprep.mubr.bf16.mxu0 %v3126_v6  ;;  %2821 = vmatprep.mubr.bf16.mxu1 %v3126_v6  ;;  %v1993_v54 = vshrl.u32 %v1992_v52, 7 }
 0x38a   : > { %2710 = vmatpush1.bf16.msra.mxu0 %v3695_v59  ;;  %2792 = vmatpush1.bf16.msra.mxu1 %v3698_v60  ;;  %v1994_v58 = vsub.s32 0, %v1993_v54  ;;  %v1990_v59 = vld [vmem:[%s320_s18] sm:$0xf]  ;;  %v1998_v60 = vsub.s32 1, %v1993_v54 }
 0x38b   : > { %2711 = vmatprep.subr.bf16.mxu0 %v3703_v61  ;;  %2793 = vmatprep.subr.bf16.mxu1 %v3706_v62  ;;  %v2002_v61 = vsub.s32 2, %v1993_v54  ;;  %v2006_v62 = vsub.s32 3, %v1993_v54 }
 0x38e   : > { %2712 = vmatpush1.bf16.msra.mxu0 %v3701_v63  ;;  %2794 = vmatpush1.bf16.msra.mxu1 %v3704_v0  ;;  %v1995_v63 = vrot.slane %v1990_v59, %v1994_v58  ;;  %v1999_v0 = vrot.slane %v1990_v59, %v1998_v60 }
 0x38f   : > { %2713 = vmatprep.subr.bf16.mxu0 %v3709_v1  ;;  %2795 = vmatprep.subr.bf16.mxu1 %v3712_v2  ;;  %v2003_v1 = vrot.slane %v1990_v59, %v2002_v61 }
 0x392   : > { %2714 = vmatpush1.bf16.msra.mxu0 %v3707_v3  ;;  %2796 = vmatpush1.bf16.msra.mxu1 %v3710_v4  ;;  %v2007_v4 = vrot.slane %v1990_v59, %v2006_v62 }
 0x393   : > { %2715 = vmatprep.subr.bf16.mxu0 %v3715_v5  ;;  %2797 = vmatprep.subr.bf16.mxu1 %v3718_v7 }
 0x396   : > { %2716 = vmatpush1.bf16.msra.mxu0 %v3713_v9  ;;  %2798 = vmatpush1.bf16.msra.mxu1 %v3716_v11 }
 0x397   : > { %2717 = vmatprep.subr.bf16.mxu0 %v3721_v15  ;;  %2799 = vmatprep.subr.bf16.mxu1 %v3724_v16 }
 0x39a   : > { %2718 = vmatpush1.bf16.msra.mxu0 %v3719_v17  ;;  %2800 = vmatpush1.bf16.msra.mxu1 %v3722_v18 }
 0x39b   : > { %2719 = vmatprep.subr.bf16.mxu0 %v3727_v8  ;;  %2801 = vmatprep.subr.bf16.mxu1 %v3730_v12 }
 0x39e   : > { %2720 = vmatpush1.bf16.msra.mxu0 %v3725_v19  ;;  %2802 = vmatpush1.bf16.msra.mxu1 %v3728_v13 }
 0x39f   : > { %2721 = vmatprep.subr.bf16.mxu0 %v3733_v14  ;;  %2803 = vmatprep.subr.bf16.mxu1 %v3736_v10 }
 0x3a2   : > { %2722 = vmatpush1.bf16.msra.mxu0 %v3731_v21  ;;  %2804 = vmatpush1.bf16.msra.mxu1 %v3734_v23 }
 0x3a3   : > { %2723 = vmatprep.subr.bf16.mxu0 %v3739_v24  ;;  %2805 = vmatprep.subr.bf16.mxu1 %v3742_v25 }
 0x3a6   : > { %2724 = vmatpush1.bf16.msra.mxu0 %v3737_v26  ;;  %2806 = vmatpush1.bf16.msra.mxu1 %v3740_v27 }
 0x3a7   : > { %2725 = vmatprep.subr.bf16.mxu0 %v3745_v28  ;;  %2807 = vmatprep.subr.bf16.mxu1 %v3748_v29 }
 0x3aa   : > { %2726 = vmatpush1.bf16.msra.mxu0 %v3743_v30  ;;  %2808 = vmatpush1.bf16.msra.mxu1 %v3746_v31 }
 0x3ab   : > { %2727 = vmatprep.subr.bf16.mxu0 %v3751_v32  ;;  %2809 = vmatprep.subr.bf16.mxu1 %v3754_v34 }
 0x3ae   : > { %2728 = vmatpush1.bf16.msra.mxu0 %v3749_v38  ;;  %2810 = vmatpush1.bf16.msra.mxu1 %v3752_v33 }
 0x3af   : > { %2729 = vmatprep.subr.bf16.mxu0 %v3757_v37  ;;  %2811 = vmatprep.subr.bf16.mxu1 %v3760_v39 }
 0x3b2   : > { %2730 = vmatpush1.bf16.msra.mxu0 %v3755_v35  ;;  %2812 = vmatpush1.bf16.msra.mxu1 %v3758_v22 }
 0x3b3   : > { %2731 = vmatprep.subr.bf16.mxu0 %v3763_v36  ;;  %2813 = vmatprep.subr.bf16.mxu1 %v3766_v41 }
 0x3b6   : > { %2732 = vmatpush1.bf16.msra.mxu0 %v3761_v40  ;;  %2814 = vmatpush1.bf16.msra.mxu1 %v3764_v42 }
 0x3b7   : > { %2733 = vmatprep.subr.bf16.mxu0 %v3769_v43  ;;  %2815 = vmatprep.subr.bf16.mxu1 %v3772_v45 }
 0x3ba   : > { %2734 = vmatpush1.bf16.msra.mxu0 %v3767_v46  ;;  %2816 = vmatpush1.bf16.msra.mxu1 %v3770_v47 }
 0x3bb   : > { %2735 = vmatprep.subr.bf16.mxu0 %v3775_v48  ;;  %2817 = vmatprep.subr.bf16.mxu1 %v3778_v49 }
 0x3be   : > { %2736 = vmatpush1.bf16.msra.mxu0 %v3773_v50  ;;  %2818 = vmatpush1.bf16.msra.mxu1 %v3776_v44 }
 0x3bf   : > { %2737 = vmatprep.subr.bf16.mxu0 %v3781_v53  ;;  %2819 = vmatprep.subr.bf16.mxu1 %v3784_v55 }
 0x3c2   : > { %2738 = vmatpush1.bf16.msra.mxu0 %v3779_v56  ;;  %2820 = vmatpush1.bf16.msra.mxu1 %v3782_v57 }
 0x3c5   : > { %2740 = vmatmul.mubr.bf16.vlgmr.msra.gmra.mrb[0].mxu0 %v3125_v51  ;;  %2822 = vmatmul.mubr.bf16.vlgmr.msra.gmra.mrb[0].mxu1 %v3125_v51 }
 0x498   : > { %v2741_v2 = vpop.f32.mrb[0].mxu0  ;;  %v2823_v3 = vpop.f32.mrb[0].mxu1 }
 0x499   : > { %v3269_v5 = vadd.f32 %v2741_v2, %v1995_v63  ;;  %v2743_v7 = vpop.f32.mrb[1].mxu0  ;;  %v2825_v9 = vpop.f32.mrb[1].mxu1  ;;  %v3271_v17 = vadd.f32 %v2823_v3, %v2003_v1 }
 0x49a   : > { %v3270_v11 = vadd.f32 %v2743_v7, %v1999_v0  ;;  %v2745_v15 = vpop.f32.mrb[2].mxu0  ;;  %v2827_v16 = vpop.f32.mrb[2].mxu1  ;;  %v3272_v12 = vadd.f32 %v2825_v9, %v2007_v4 }
 0x49b   : > { %2830 = vst [vmem:[%s4316_s9] sm:$0xff] %v3269_v5  ;;  %v2746_v18 = vpop.f32.mrb[3].mxu0  ;;  %v2828_v8 = vpop.f32.mrb[3].mxu1  ;;  %2832 = vst [vmem:[%s4316_s9 + $0x10] sm:$0xff] %v3271_v17 }
 0x49c   : > { %2831 = vst [vmem:[%s4316_s9 + $0x8] sm:$0xff] %v3270_v11  ;;  %2833 = vst [vmem:[%s4316_s9 + $0x18] sm:$0xff] %v3272_v12 }
 0x49d PF: > { %p16_p5 = scmp.ge.s32.totalorder %s4075_s26, 4   ;;  %s4612_s21 = smov %s3997_s22 }
 0x49e   : > { %s4613_s22 = smov %s4001_s23  ;;  %s4614_s23 = smov %s4085_s29 }
 0x49f   : > { %s4615_s24 = smov %s4075_s26  ;;  %18 = sbr.rel (!%p16_p5) target bundleno = 8 (0x8), region = 117 }
 0x4a6   :  { %2856 = vsyncpa [#allocation4], 1 }
 0x4a7   :  { %2858 = vsyncpa [#allocation4 + $0x1], 1 }
 0x4a8   :  { %2859 = vsyncpa [#allocation6], 1 }
 0x4a9   :  { %2860 = vsyncpa [#allocation9], 1 }

</bundles_post_ra>
